<compile_context>
chip_gen: v7x
topology: tpu7x:2x2x1
jax: 0.10.0
libtpu: 0.0.40
codegen_flags: <defaults>
</compile_context>

<pallas_src>
import math
import numpy as np
import jax
import jax.numpy as jnp
from jax.experimental import pallas as pl
from jax.experimental.pallas import tpu as pltpu

# Small shapes consistent with the module's forward: x is [batch, seq, input_dim].
B = 8
S = 16
ROWS = B * S            # 128 rows -> full MXU M-dim in one shot
IN_DIM = 64
PAD_IN = 128            # zero-padded K for layer 1 (pairs with W1 padding)
H1 = 128
H2 = 128
OUT_DIM = 128
EPS = 1e-6


def _layer_norm(h, gamma, beta, dim):
    """Custom LayerNorm: unbiased std (ddof=1), eps added to std."""
    mean = jnp.mean(h, axis=-1, keepdims=True)
    var = jnp.sum((h - mean) ** 2, axis=-1, keepdims=True) * (1.0 / (dim - 1))
    std = jnp.sqrt(var)
    inv = pl.reciprocal(std + EPS, approx=False)   # exact 1/x (EUP vrcp + NR refine)
    return (h - mean) * inv * gamma + beta


def mlp_kernel(x_ref, w_ref, vec_ref, out_ref):
    """x_ref: [ROWS, PAD_IN]; w_ref: [3, 128, 128]; vec_ref: [8, 128] packed vectors."""
    x = x_ref[...]                                  # [ROWS, PAD_IN] (lane-dense)

    # Packed (8,128) vector slab: rows 0..6 = b1, g1, be1, b2, g2, be2, b3.
    b1  = vec_ref[0:1, :]
    g1  = vec_ref[1:2, :]
    be1 = vec_ref[2:3, :]
    b2  = vec_ref[3:4, :]
    g2  = vec_ref[4:5, :]
    be2 = vec_ref[5:6, :]
    b3  = vec_ref[6:7, :]

    # ---- layer 1: Linear -> LayerNorm -> ReLU -> (Dropout = identity) ----
    h = jnp.dot(x, w_ref[0], preferred_element_type=jnp.float32) + b1
    h = _layer_norm(h, g1, be1, H1)
    h = jnp.maximum(h, 0.0)
    # TODO(synk): nn.Dropout omitted (eval-mode identity).

    # ---- layer 2: Linear -> LayerNorm -> ReLU -> (Dropout = identity) ----
    h = jnp.dot(h, w_ref[1], preferred_element_type=jnp.float32) + b2
    h = _layer_norm(h, g2, be2, H2)
    h = jnp.maximum(h, 0.0)

    # ---- output projection (unmasked full-lane store) ----
    out_ref[...] = (jnp.dot(h, w_ref[2], preferred_element_type=jnp.float32) + b3)


def pack_params(W1, b1, g1, be1, W2, b2, g2, be2, W3, b3):
    """Pack 10 small params into one (3,128,128) weight slab + one (8,128) vector slab."""
    W1p = jnp.zeros((PAD_IN, H1), jnp.float32).at[:IN_DIM, :].set(W1)
    w_slab = jnp.stack([W1p, W2, W3], axis=0)                      # [3,128,128]

    vec_slab = jnp.zeros((8, H1), jnp.float32)                     # [8,128]
    for row, v in enumerate((b1, g1, be1, b2, g2, be2, b3)):
        vec_slab = vec_slab.at[row, :].set(v.reshape(-1))
    return w_slab, vec_slab


def mlp_forward(x, w_slab, vec_slab):
    """x: [B, S, IN_DIM] -> [B, S, OUT_DIM].  Single fused kernel invocation."""
    b, s, _ = x.shape
    x2 = x.reshape(b * s, IN_DIM)                    # batch fusion: one big M-dim
    x2 = jnp.pad(x2, ((0, 0), (0, PAD_IN - IN_DIM))) # lane-dense K=128 LHS

    flops = 2 * ROWS * (PAD_IN * H1 + H1 * H2 + H2 * OUT_DIM)
    bytes_accessed = 4 * (x2.size + w_slab.size + vec_slab.size + ROWS * OUT_DIM)
    transcendentals = 4 * ROWS                       # 2x sqrt + 2x rcp per row

    out = pl.pallas_call(
        mlp_kernel,
        out_shape=jax.ShapeDtypeStruct((b * s, OUT_DIM), jnp.float32),
        # No grid: whole problem (<350 KB) lives in VMEM for one step; avoids
        # per-grid-step pipeline overhead and duplicate weight DMAs.
        in_specs=[pl.BlockSpec(memory_space=pltpu.MemorySpace.VMEM)] * 3,
        out_specs=pl.BlockSpec(memory_space=pltpu.MemorySpace.VMEM),
        cost_estimate=pl.CostEstimate(flops=flops,
                                      transcendentals=transcendentals,
                                      bytes_accessed=bytes_accessed),
    )(x2, w_slab, vec_slab)
    return out.reshape(b, s, OUT_DIM)


def reference_forward(x, W1, b1, g1, be1, W2, b2, g2, be2, W3, b3):
    """Pure-JAX reference reproducing the PyTorch forward (eval mode)."""
    def ln(h, g, bt):
        mean = h.mean(-1, keepdims=True)
        var = jnp.sum((h - mean) ** 2, -1, keepdims=True) / (h.shape[-1] - 1)
        std = jnp.sqrt(var)
        return (h - mean) / (std + EPS) * g + bt

    x2 = x.reshape(-1, IN_DIM)
    h = jnp.dot(x2, W1, preferred_element_type=jnp.float32) + b1
    h = jnp.maximum(ln(h, g1, be1), 0.0)
    h = jnp.dot(h, W2, preferred_element_type=jnp.float32) + b2
    h = jnp.maximum(ln(h, g2, be2), 0.0)
    out = jnp.dot(h, W3, preferred_element_type=jnp.float32) + b3
    return out.reshape(x.shape[0], x.shape[1], OUT_DIM)


def _init_linear(key, fan_in, fan_out):
    """PyTorch nn.Linear default init, weight stored as [in, out], bias as [out]."""
    kw, kb = jax.random.split(key)
    lim = 1.0 / math.sqrt(fan_in)
    W = jax.random.uniform(kw, (fan_in, fan_out), minval=-lim, maxval=lim,
                           dtype=jnp.float32)
    bias = jax.random.uniform(kb, (fan_out,), minval=-lim, maxval=lim,
                              dtype=jnp.float32)
    return W, bias


if __name__ == "__main__":
    key = jax.random.PRNGKey(0)
    kx, k1, k2, k3 = jax.random.split(key, 4)

    x = jax.random.normal(kx, (B, S, IN_DIM), dtype=jnp.float32)

    W1, b1 = _init_linear(k1, IN_DIM, H1)
    W2, b2 = _init_linear(k2, H1, H2)
    W3, b3 = _init_linear(k3, H2, OUT_DIM)
    g1 = jnp.ones((H1,), dtype=jnp.float32)
    be1 = jnp.zeros((H1,), dtype=jnp.float32)
    g2 = jnp.ones((H2,), dtype=jnp.float32)
    be2 = jnp.zeros((H2,), dtype=jnp.float32)

    raw_params = (W1, b1, g1, be1, W2, b2, g2, be2, W3, b3)
    w_slab, vec_slab = pack_params(*raw_params)

    out = mlp_forward(x, w_slab, vec_slab)
    out = jax.block_until_ready(out)

    ref = reference_forward(x, *raw_params)
    np.testing.assert_allclose(np.asarray(out), np.asarray(ref),
                               rtol=2e-4, atol=2e-4)

    print("KERNEL_OK")
</pallas_src>

<mosaic_0001>
module attributes {stable_mosaic.version = 11 : i64} {
  func.func @mlp_kernel(%arg0: memref<128x128xf32, #tpu.memory_space<vmem>>, %arg1: memref<3x128x128xf32, #tpu.memory_space<vmem>>, %arg2: memref<8x128xf32, #tpu.memory_space<vmem>>, %arg3: memref<128x128xf32, #tpu.memory_space<vmem>>) attributes {dimension_semantics = [], scalar_prefetch = 0 : i64, scratch_operands = 0 : i64, tpu.core_type = #tpu.core_type<tc>} {
    %c0 = arith.constant 0 : index
    %c0_0 = arith.constant 0 : index
    %0 = vector.load %arg0[%c0, %c0_0] : memref<128x128xf32, #tpu.memory_space<vmem>>, vector<128x128xf32>
    %c0_1 = arith.constant 0 : index
    %c0_2 = arith.constant 0 : index
    %1 = vector.load %arg2[%c0_1, %c0_2] : memref<8x128xf32, #tpu.memory_space<vmem>>, vector<1x128xf32>
    %c1 = arith.constant 1 : index
    %c0_3 = arith.constant 0 : index
    %2 = vector.load %arg2[%c1, %c0_3] : memref<8x128xf32, #tpu.memory_space<vmem>>, vector<1x128xf32>
    %c2 = arith.constant 2 : index
    %c0_4 = arith.constant 0 : index
    %3 = vector.load %arg2[%c2, %c0_4] : memref<8x128xf32, #tpu.memory_space<vmem>>, vector<1x128xf32>
    %c3 = arith.constant 3 : index
    %c0_5 = arith.constant 0 : index
    %4 = vector.load %arg2[%c3, %c0_5] : memref<8x128xf32, #tpu.memory_space<vmem>>, vector<1x128xf32>
    %c4 = arith.constant 4 : index
    %c0_6 = arith.constant 0 : index
    %5 = vector.load %arg2[%c4, %c0_6] : memref<8x128xf32, #tpu.memory_space<vmem>>, vector<1x128xf32>
    %c5 = arith.constant 5 : index
    %c0_7 = arith.constant 0 : index
    %6 = vector.load %arg2[%c5, %c0_7] : memref<8x128xf32, #tpu.memory_space<vmem>>, vector<1x128xf32>
    %c6 = arith.constant 6 : index
    %c0_8 = arith.constant 0 : index
    %7 = vector.load %arg2[%c6, %c0_8] : memref<8x128xf32, #tpu.memory_space<vmem>>, vector<1x128xf32>
    %c0_9 = arith.constant 0 : index
    %c0_10 = arith.constant 0 : index
    %c0_11 = arith.constant 0 : index
    %8 = vector.load %arg1[%c0_9, %c0_10, %c0_11] : memref<3x128x128xf32, #tpu.memory_space<vmem>>, vector<1x128x128xf32>
    %9 = vector.shape_cast %8 : vector<1x128x128xf32> to vector<128x128xf32>
    %cst = arith.constant dense<0.000000e+00> : vector<128x128xf32>
    %10 = tpu.matmul %0, %9, %cst {dimension_numbers = #tpu.dot_dimension_numbers<[1], [0], [0], [1], [0, 0, 1, 1], [], []>} : vector<128x128xf32>, vector<128x128xf32>, vector<128x128xf32> -> vector<128x128xf32>
    %11 = vector.broadcast %1 : vector<1x128xf32> to vector<128x128xf32>
    %12 = arith.addf %10, %11 : vector<128x128xf32>
    %cst_12 = arith.constant dense<0.000000e+00> : vector<128xf32>
    %13 = vector.multi_reduction <add>, %12, %cst_12 [1] : vector<128x128xf32> to vector<128xf32>
    %14 = vector.shape_cast %13 : vector<128xf32> to vector<128x1xf32>
    %cst_13 = arith.constant 1.280000e+02 : f32
    %15 = vector.broadcast %cst_13 : f32 to vector<128x1xf32>
    %16 = arith.divf %14, %15 : vector<128x1xf32>
    %17 = vector.broadcast %16 : vector<128x1xf32> to vector<128x128xf32>
    %18 = arith.subf %12, %17 : vector<128x128xf32>
    %19 = arith.mulf %18, %18 : vector<128x128xf32>
    %cst_14 = arith.constant dense<0.000000e+00> : vector<128xf32>
    %20 = vector.multi_reduction <add>, %19, %cst_14 [1] : vector<128x128xf32> to vector<128xf32>
    %21 = vector.shape_cast %20 : vector<128xf32> to vector<128x1xf32>
    %cst_15 = arith.constant 0.00787401571 : f32
    %22 = vector.broadcast %cst_15 : f32 to vector<128x1xf32>
    %23 = arith.mulf %21, %22 : vector<128x1xf32>
    %24 = math.sqrt %23 : vector<128x1xf32>
    %cst_16 = arith.constant 9.99999997E-7 : f32
    %25 = vector.broadcast %cst_16 : f32 to vector<128x1xf32>
    %26 = arith.addf %24, %25 : vector<128x1xf32>
    %27 = tpu.reciprocal %26 : vector<128x1xf32> -> vector<128x1xf32>
    %28 = vector.broadcast %16 : vector<128x1xf32> to vector<128x128xf32>
    %29 = arith.subf %12, %28 : vector<128x128xf32>
    %30 = vector.broadcast %27 : vector<128x1xf32> to vector<128x128xf32>
    %31 = arith.mulf %29, %30 : vector<128x128xf32>
    %32 = vector.broadcast %2 : vector<1x128xf32> to vector<128x128xf32>
    %33 = arith.mulf %31, %32 : vector<128x128xf32>
    %34 = vector.broadcast %3 : vector<1x128xf32> to vector<128x128xf32>
    %35 = arith.addf %33, %34 : vector<128x128xf32>
    %cst_17 = arith.constant 0.000000e+00 : f32
    %36 = vector.broadcast %cst_17 : f32 to vector<128x128xf32>
    %37 = arith.maximumf %35, %36 : vector<128x128xf32>
    %c1_18 = arith.constant 1 : index
    %c0_19 = arith.constant 0 : index
    %c0_20 = arith.constant 0 : index
    %38 = vector.load %arg1[%c1_18, %c0_19, %c0_20] : memref<3x128x128xf32, #tpu.memory_space<vmem>>, vector<1x128x128xf32>
    %39 = vector.shape_cast %38 : vector<1x128x128xf32> to vector<128x128xf32>
    %cst_21 = arith.constant dense<0.000000e+00> : vector<128x128xf32>
    %40 = tpu.matmul %37, %39, %cst_21 {dimension_numbers = #tpu.dot_dimension_numbers<[1], [0], [0], [1], [0, 0, 1, 1], [], []>} : vector<128x128xf32>, vector<128x128xf32>, vector<128x128xf32> -> vector<128x128xf32>
    %41 = vector.broadcast %4 : vector<1x128xf32> to vector<128x128xf32>
    %42 = arith.addf %40, %41 : vector<128x128xf32>
    %cst_22 = arith.constant dense<0.000000e+00> : vector<128xf32>
    %43 = vector.multi_reduction <add>, %42, %cst_22 [1] : vector<128x128xf32> to vector<128xf32>
    %44 = vector.shape_cast %43 : vector<128xf32> to vector<128x1xf32>
    %cst_23 = arith.constant 1.280000e+02 : f32
    %45 = vector.broadcast %cst_23 : f32 to vector<128x1xf32>
    %46 = arith.divf %44, %45 : vector<128x1xf32>
    %47 = vector.broadcast %46 : vector<128x1xf32> to vector<128x128xf32>
    %48 = arith.subf %42, %47 : vector<128x128xf32>
    %49 = arith.mulf %48, %48 : vector<128x128xf32>
    %cst_24 = arith.constant dense<0.000000e+00> : vector<128xf32>
    %50 = vector.multi_reduction <add>, %49, %cst_24 [1] : vector<128x128xf32> to vector<128xf32>
    %51 = vector.shape_cast %50 : vector<128xf32> to vector<128x1xf32>
    %cst_25 = arith.constant 0.00787401571 : f32
    %52 = vector.broadcast %cst_25 : f32 to vector<128x1xf32>
    %53 = arith.mulf %51, %52 : vector<128x1xf32>
    %54 = math.sqrt %53 : vector<128x1xf32>
    %cst_26 = arith.constant 9.99999997E-7 : f32
    %55 = vector.broadcast %cst_26 : f32 to vector<128x1xf32>
    %56 = arith.addf %54, %55 : vector<128x1xf32>
    %57 = tpu.reciprocal %56 : vector<128x1xf32> -> vector<128x1xf32>
    %58 = vector.broadcast %46 : vector<128x1xf32> to vector<128x128xf32>
    %59 = arith.subf %42, %58 : vector<128x128xf32>
    %60 = vector.broadcast %57 : vector<128x1xf32> to vector<128x128xf32>
    %61 = arith.mulf %59, %60 : vector<128x128xf32>
    %62 = vector.broadcast %5 : vector<1x128xf32> to vector<128x128xf32>
    %63 = arith.mulf %61, %62 : vector<128x128xf32>
    %64 = vector.broadcast %6 : vector<1x128xf32> to vector<128x128xf32>
    %65 = arith.addf %63, %64 : vector<128x128xf32>
    %cst_27 = arith.constant 0.000000e+00 : f32
    %66 = vector.broadcast %cst_27 : f32 to vector<128x128xf32>
    %67 = arith.maximumf %65, %66 : vector<128x128xf32>
    %c2_28 = arith.constant 2 : index
    %c0_29 = arith.constant 0 : index
    %c0_30 = arith.constant 0 : index
    %68 = vector.load %arg1[%c2_28, %c0_29, %c0_30] : memref<3x128x128xf32, #tpu.memory_space<vmem>>, vector<1x128x128xf32>
    %69 = vector.shape_cast %68 : vector<1x128x128xf32> to vector<128x128xf32>
    %cst_31 = arith.constant dense<0.000000e+00> : vector<128x128xf32>
    %70 = tpu.matmul %67, %69, %cst_31 {dimension_numbers = #tpu.dot_dimension_numbers<[1], [0], [0], [1], [0, 0, 1, 1], [], []>} : vector<128x128xf32>, vector<128x128xf32>, vector<128x128xf32> -> vector<128x128xf32>
    %71 = vector.broadcast %7 : vector<1x128xf32> to vector<128x128xf32>
    %72 = arith.addf %70, %71 : vector<128x128xf32>
    %c0_32 = arith.constant 0 : index
    %c0_33 = arith.constant 0 : index
    %73 = vector.load %arg3[%c0_32, %c0_33] : memref<128x128xf32, #tpu.memory_space<vmem>>, vector<128x128xf32>
    tpu.vector_store %arg3[%c0_32, %c0_33], %72 {strides = array<i32>} : memref<128x128xf32, #tpu.memory_space<vmem>>, vector<128x128xf32>,
    return
  }
}

</mosaic_0001>

<bundles_post_ra>
// kernel: tpu_custom_call.1
= control target key start
LH: loop header
LB: loop body
LE: loop exit
PB: predicated region body
PF: predicated region fallthrough
CT: control target
= control target key end

     0   :  { %8 = vsyncpa [#allocation3], 0  ;;  %s2611_s0 = inlined_call_operand.hbm [shape: f32[128,128], index: 0, kind: input, shape index: {}]   ;;  %s2612_s1 = inlined_call_operand.hbm [shape: f32[3,128,128], index: 1, kind: input, shape index: {}]   ;;  %s2613_s2 = inlined_call_operand.hbm [shape: f32[8,128], index: 2, kind: input, shape index: {}]   ;;  %s2614_s3 = inlined_call_operand.hbm [shape: f32[128,128], index: 3, kind: output, shape index: {}]  }
   0x1   :  { %9 = vsyncpa [#allocation6], 0 }
   0x2   :  { %10 = vsyncpa [#allocation4], 0  ;;  %s1908_s12 = smov [#allocation5]   ;;  %s1909_s14 = smov [#allocation2]  }
   0x3   :  { %s28_s13 = sshll.u32 %s1908_s12, 4  ;;  %s16_s15 = sshll.u32 %s1909_s14, 4  ;;  %s29_s13 = int_to_ptr.vmem [resolvable:$true] %s28_s13  ;;  %s1934_s15 = int_to_ptr.vmem [resolvable:$true] %s16_s15 }
   0x4   :  { %s1814_s18 = scalar_lea.hbm %s2612_s1, 6144 }
   0x5   :  { %p1815_p0 = scmp.ne.s32.totalorder %s2612_s1, %s1814_s18  ;;  %p1818_p1 = scmp.lt.u32.totalorder %s1814_s18, %s2612_s1 }
   0x7   :  { %p1820_p2 = pnand %p1818_p1, %p1815_p0 }
   0x9   :  { %1823 = shalt.err (!%p1820_p2)
}
   0xa   :  { %s1824_s23 = scalar_lea.vmem %s29_s13, 6144  ;;  %p1829_p4 = scmp.lt.s32.totalorder %s29_s13, %s29_s13 }
   0xb   :  { %p1825_p3 = scmp.ne.s32.totalorder %s29_s13, %s1824_s23  ;;  %p1830_p5 = scmp.lt.s32.totalorder %s1824_s23, %s1824_s23 }
   0xd   :  { %p1831_p6 = por %p1830_p5, %p1829_p4 }
   0xf   :  { %p1832_p7 = pnand %p1831_p6, %p1825_p3 }
  0x11   :  { %1835 = shalt.err (!%p1832_p7)
}
  0x12   :  { %s1910_s24 = smov 128   ;;  %s1911_s25 = smov 8  }
  0x13   :  { %34 = dma.hbm_to_vmem [thread:$0]  %s2612_s1, 6144, %s29_s13, [#allocation6], %s1910_s24, %s1910_s24, %s1911_s25  }
  0x14   :  { %s1836_s30 = scalar_lea.hbm %s2611_s0, 2048 }
  0x15   :  { %p1837_p8 = scmp.ne.s32.totalorder %s2611_s0, %s1836_s30  ;;  %p1840_p9 = scmp.lt.u32.totalorder %s1836_s30, %s2611_s0 }
  0x17   :  { %p1842_p10 = pnand %p1840_p9, %p1837_p8 }
  0x19   :  { %1845 = shalt.err (!%p1842_p10)
}
  0x1a   :  { %s1846_s8 = scalar_lea.vmem %s1934_s15, 2048  ;;  %p1851_p12 = scmp.lt.s32.totalorder %s1934_s15, %s1934_s15 }
  0x1b   :  { %p1847_p11 = scmp.ne.s32.totalorder %s1934_s15, %s1846_s8  ;;  %p1852_p13 = scmp.lt.s32.totalorder %s1846_s8, %s1846_s8 }
  0x1d   :  { %p1853_p0 = por %p1852_p13, %p1851_p12 }
  0x1f   :  { %p1854_p1 = pnand %p1853_p0, %p1847_p11 }
  0x21   :  { %1857 = shalt.err (!%p1854_p1)
}
  0x22   :  { %22 = dma.hbm_to_vmem [thread:$0]  %s2611_s0, 2048, %s1934_s15, [#allocation3], %s1910_s24, %s1910_s24, %s1911_s25  }
  0x23   :  { %s1912_s10 = smov [#allocation7]   ;;  %s1858_s14 = scalar_lea.hbm %s2613_s2, 128 }
  0x24   :  { %s41_s11 = sshll.u32 %s1912_s10, 4  ;;  %p1859_p2 = scmp.ne.s32.totalorder %s2613_s2, %s1858_s14  ;;  %s42_s11 = int_to_ptr.vmem [resolvable:$true] %s41_s11 }
  0x25   :  { %p1862_p3 = scmp.lt.u32.totalorder %s1858_s14, %s2613_s2 }
  0x27   :  { %p1864_p4 = pnand %p1862_p3, %p1859_p2 }
  0x29   :  { %1867 = shalt.err (!%p1864_p4)
}
  0x2a   :  { %s1868_s20 = scalar_lea.vmem %s42_s11, 128  ;;  %p1873_p6 = scmp.lt.s32.totalorder %s42_s11, %s42_s11 }
  0x2b   :  { %p1869_p5 = scmp.ne.s32.totalorder %s42_s11, %s1868_s20  ;;  %p1874_p7 = scmp.lt.s32.totalorder %s1868_s20, %s1868_s20 }
  0x2d   :  { %p1875_p8 = por %p1874_p7, %p1873_p6 }
  0x2f   :  { %p1876_p9 = pnand %p1875_p8, %p1869_p5 }
  0x31   :  { %1879 = shalt.err (!%p1876_p9)
}
  0x32   :  { %44 = dma.hbm_to_vmem [thread:$0]  %s2613_s2, 128, %s42_s11, [#allocation6]  }
  0x33   :  { %1902 = dma.done.wait [#allocation3], 2048  }
  0x34   :  { %1903 = vsyncadd [#allocation3], 4294965248 }
  0x35   :  { %1904 = dma.done.wait [#allocation6], 6272  }
  0x36   :  { %1905 = vsyncadd [#allocation6], 4294961024  ;;  %v77_v0 = vld [vmem:[#allocation5] sm:$0xff]  ;;  %v78_v1 = vld [vmem:[#allocation5 + $0x8] sm:$0xff]  ;;  %s1913_s2 = smov [#allocation8]  }
  0x37   :  { %v79_v2 = vld [vmem:[#allocation5 + $0x10] sm:$0xff]  ;;  %v1568_v3 = vpack.c.bf16 %v78_v1, %v77_v0  ;;  %v80_v4 = vld [vmem:[#allocation5 + $0x18] sm:$0xff]  ;;  %v81_v6 = vld [vmem:[#allocation5 + $0x20] sm:$0xff]  ;;  %s1284_s21 = sshll.u32 %s1913_s2, 4  ;;  %s1285_s21 = int_to_ptr.vmem [resolvable:$true] %s1284_s21 }
  0x38   :  { %v1572_v5 = vpack.c.bf16 %v80_v4, %v79_v2  ;;  %v82_v7 = vld [vmem:[#allocation5 + $0x28] sm:$0xff]  ;;  %v54_v9 = vld [vmem:[#allocation2] sm:$0xff]  ;;  %v83_v10 = vld [vmem:[#allocation5 + $0x30] sm:$0xff]  ;;  %s1880_s22 = scalar_lea.vmem %s1285_s21, 2048  ;;  %p1885_p11 = scmp.lt.s32.totalorder %s1285_s21, %s1285_s21 }
  0x39   :  { %1569 = vmatprep.subr.bf16.mxu0 %v1568_v3  ;;  %v1576_v8 = vpack.c.bf16 %v82_v7, %v81_v6  ;;  %v84_v11 = vld [vmem:[#allocation5 + $0x38] sm:$0xff]  ;;  %1432 = vmatprep.mubr.f32.mxu0 %v54_v9  ;;  %v85_v13 = vld [vmem:[#allocation5 + $0x40] sm:$0xff]  ;;  %v86_v14 = vld [vmem:[#allocation5 + $0x48] sm:$0xff]  ;;  %p1881_p10 = scmp.ne.s32.totalorder %s1285_s21, %s1880_s22  ;;  %p1886_p12 = scmp.lt.s32.totalorder %s1880_s22, %s1880_s22 }
  0x3a   :  { %1571 = vmatpush3.bf16.msra.mxu0 %v1568_v3  ;;  %v1580_v12 = vpack.c.bf16 %v84_v11, %v83_v10  ;;  %v1584_v15 = vpack.c.bf16 %v86_v14, %v85_v13  ;;  %v87_v16 = vld [vmem:[#allocation5 + $0x50] sm:$0xff]  ;;  %v88_v17 = vld [vmem:[#allocation5 + $0x58] sm:$0xff]  ;;  %v89_v19 = vld [vmem:[#allocation5 + $0x60] sm:$0xff] }
  0x3b   :  { %1573 = vmatprep.subr.bf16.mxu0 %v1572_v5  ;;  %v1588_v18 = vpack.c.bf16 %v88_v17, %v87_v16  ;;  %v90_v20 = vld [vmem:[#allocation5 + $0x68] sm:$0xff]  ;;  %v91_v22 = vld [vmem:[#allocation5 + $0x70] sm:$0xff]  ;;  %v92_v23 = vld [vmem:[#allocation5 + $0x78] sm:$0xff]  ;;  %p1887_p13 = por %p1886_p12, %p1885_p11 }
  0x3c   :  { %v1592_v21 = vpack.c.bf16 %v90_v20, %v89_v19  ;;  %v1596_v24 = vpack.c.bf16 %v92_v23, %v91_v22  ;;  %v55_v25 = vld [vmem:[#allocation2 + $0x8] sm:$0xff]  ;;  %v56_v26 = vld [vmem:[#allocation2 + $0x10] sm:$0xff]  ;;  %v57_v27 = vld [vmem:[#allocation2 + $0x18] sm:$0xff] }
  0x3d   :  { %v58_v28 = vld [vmem:[#allocation2 + $0x20] sm:$0xff]  ;;  %v59_v29 = vld [vmem:[#allocation2 + $0x28] sm:$0xff]  ;;  %v60_v30 = vld [vmem:[#allocation2 + $0x30] sm:$0xff]  ;;  %p1888_p0 = pnand %p1887_p13, %p1881_p10 }
  0x3e   :  { %1575 = vmatpush3.bf16.msra.mxu0 %v1572_v5  ;;  %v61_v31 = vld [vmem:[#allocation2 + $0x38] sm:$0xff]  ;;  %v62_v32 = vld [vmem:[#allocation2 + $0x40] sm:$0xff]  ;;  %v63_v33 = vld [vmem:[#allocation2 + $0x48] sm:$0xff] }
  0x3f   :  { %1577 = vmatprep.subr.bf16.mxu0 %v1576_v8  ;;  %v64_v34 = vld [vmem:[#allocation2 + $0x50] sm:$0xff]  ;;  %v65_v35 = vld [vmem:[#allocation2 + $0x58] sm:$0xff]  ;;  %v66_v36 = vld [vmem:[#allocation2 + $0x60] sm:$0xff] }
  0x40   :  { %v67_v37 = vld [vmem:[#allocation2 + $0x68] sm:$0xff]  ;;  %v68_v38 = vld [vmem:[#allocation2 + $0x70] sm:$0xff]  ;;  %v69_v39 = vld [vmem:[#allocation2 + $0x78] sm:$0xff] }
  0x41   :  { %v1297_v40 = vld [vmem:[#allocation7] ss:$0 sm:$0xff] }
  0x42   :  { %1579 = vmatpush3.bf16.msra.mxu0 %v1576_v8 }
  0x43   :  { %1581 = vmatprep.subr.bf16.mxu0 %v1580_v12 }
  0x46   :  { %1583 = vmatpush3.bf16.msra.mxu0 %v1580_v12 }
  0x47   :  { %1585 = vmatprep.subr.bf16.mxu0 %v1584_v15 }
  0x4a   :  { %1587 = vmatpush3.bf16.msra.mxu0 %v1584_v15 }
  0x4b   :  { %1589 = vmatprep.subr.bf16.mxu0 %v1588_v18 }
  0x4e   :  { %1591 = vmatpush3.bf16.msra.mxu0 %v1588_v18 }
  0x4f   :  { %1593 = vmatprep.subr.bf16.mxu0 %v1592_v21 }
  0x52   :  { %1595 = vmatpush3.bf16.msra.mxu0 %v1592_v21 }
  0x53   :  { %1597 = vmatprep.subr.bf16.mxu0 %v1596_v24 }
  0x56   :  { %1599 = vmatpush3.bf16.msra.mxu0 %v1596_v24 }
  0x59   :  { %1433 = vmatmul.mubr.f32.vlgmr.msra.gmra.mrb[0].mxu0 %v55_v25 }
  0x5a   :  { %1435 = vmatprep.mubr.f32.mxu0 %v56_v26 }
  0x5d   :  { %1436 = vmatmul.mubr.f32.gmra.mrb[2].mxu0 %v57_v27 }
  0x5e   :  { %1438 = vmatprep.mubr.f32.mxu0 %v58_v28 }
  0x61   :  { %1439 = vmatmul.mubr.f32.gmra.mrb[4].mxu0 %v59_v29 }
  0x62   :  { %1441 = vmatprep.mubr.f32.mxu0 %v60_v30 }
  0x65   :  { %1442 = vmatmul.mubr.f32.gmra.mrb[6].mxu0 %v61_v31 }
  0x66   :  { %1444 = vmatprep.mubr.f32.mxu0 %v62_v32 }
  0x69   :  { %1445 = vmatmul.mubr.f32.gmra.mrb[8].mxu0 %v63_v33 }
  0x6a   :  { %1447 = vmatprep.mubr.f32.mxu0 %v64_v34 }
  0x6d   :  { %1448 = vmatmul.mubr.f32.gmra.mrb[10].mxu0 %v65_v35 }
  0x6e   :  { %1450 = vmatprep.mubr.f32.mxu0 %v66_v36 }
  0x71   :  { %1451 = vmatmul.mubr.f32.gmra.mrb[12].mxu0 %v67_v37 }
  0x72   :  { %1453 = vmatprep.mubr.f32.mxu0 %v68_v38 }
  0x75   :  { %1454 = vmatmul.mubr.f32.gmra.mrb[14].mxu0 %v69_v39 }
 0x12c   :  { %v1434_v41 = vpop.f32.mrb[0].mxu0 }
 0x12d   :  { %v163_v42 = vpop.f32.mrb[1].mxu0  ;;  %v169_v46 = vadd.f32 %v1434_v41, %v1297_v40 }
 0x12e   :  { %v164_v43 = vadd.f32 %v1297_v40, %v163_v42 }
 0x130   :  { %v1437_v44 = vpop.f32.mrb[2].mxu0  ;;  %242 = vadd.xlane.f32.xlu0 %v164_v43 }
 0x131   :  { %v173_v45 = vpop.f32.mrb[3].mxu0  ;;  %v179_v50 = vadd.f32 %v1437_v44, %v1297_v40 }
 0x132   :  { %v174_v47 = vadd.f32 %v1297_v40, %v173_v45 }
 0x134   :  { %v1440_v48 = vpop.f32.mrb[4].mxu0  ;;  %246 = vadd.xlane.f32.xlu1 %v174_v47  ;;  %244 = vadd.xlane.f32.xlu0 %v169_v46 }
 0x135   :  { %v183_v49 = vpop.f32.mrb[5].mxu0  ;;  %v189_v54 = vadd.f32 %v1440_v48, %v1297_v40 }
 0x136   :  { %v184_v51 = vadd.f32 %v1297_v40, %v183_v49 }
 0x138   :  { %v1443_v52 = vpop.f32.mrb[6].mxu0  ;;  %248 = vadd.xlane.f32.xlu1 %v179_v50  ;;  %250 = vadd.xlane.f32.xlu0 %v184_v51 }
 0x139   :  { %v193_v53 = vpop.f32.mrb[7].mxu0  ;;  %v199_v58 = vadd.f32 %v1443_v52, %v1297_v40 }
 0x13a   :  { %v194_v55 = vadd.f32 %v1297_v40, %v193_v53 }
 0x13c   :  { %v1446_v56 = vpop.f32.mrb[8].mxu0  ;;  %252 = vadd.xlane.f32.xlu1 %v189_v54  ;;  %254 = vadd.xlane.f32.xlu0 %v194_v55 }
 0x13d   :  { %v203_v57 = vpop.f32.mrb[9].mxu0  ;;  %v1983_v62 = vadd.f32 %v1446_v56, %v1297_v40 }
 0x13e   :  { %v204_v59 = vadd.f32 %v1297_v40, %v203_v57 }
 0x140   :  { %v1449_v60 = vpop.f32.mrb[10].mxu0  ;;  %256 = vadd.xlane.f32.xlu1 %v199_v58  ;;  %258 = vadd.xlane.f32.xlu0 %v204_v59 }
 0x141   :  { %v213_v61 = vpop.f32.mrb[11].mxu0  ;;  %v1987_v0 = vadd.f32 %v1449_v60, %v1297_v40 }
 0x142   :  { %v1985_v63 = vadd.f32 %v1297_v40, %v213_v61 }
 0x144   :  { %v1452_v1 = vpop.f32.mrb[12].mxu0  ;;  %260 = vadd.xlane.f32.xlu1 %v1983_v62  ;;  %262 = vadd.xlane.f32.xlu0 %v1985_v63 }
 0x145   :  { %v223_v2 = vpop.f32.mrb[13].mxu0  ;;  %v1993_v4 = vadd.f32 %v1452_v1, %v1297_v40 }
 0x146   :  { %v1991_v3 = vadd.f32 %v1297_v40, %v223_v2  ;;  %v588_v2 = vld [vmem:[#allocation5 + $0x80] sm:$0xff] }
 0x148   :  { %v1455_v5 = vpop.f32.mrb[14].mxu0  ;;  %264 = vadd.xlane.f32.xlu1 %v1987_v0  ;;  %266 = vadd.xlane.f32.xlu0 %v1991_v3 }
 0x149   :  { %v233_v6 = vpop.f32.mrb[15].mxu0  ;;  %v1999_v8 = vadd.f32 %v1455_v5, %v1297_v40  ;;  %v589_v5 = vld [vmem:[#allocation5 + $0x88] sm:$0xff] }
 0x14a   :  { %v1997_v7 = vadd.f32 %v1297_v40, %v233_v6  ;;  %v1600_v6 = vpack.c.bf16 %v589_v5, %v588_v2 }
 0x14c   :  { %268 = vadd.xlane.f32.xlu1 %v1993_v4  ;;  %270 = vadd.xlane.f32.xlu0 %v1997_v7 }
 0x14d   :  { %1601 = vmatprep.subr.bf16.mxu1 %v1600_v6 }
 0x14e   :  { %1603 = vmatpush3.bf16.msra.mxu1 %v1600_v6 }
 0x150   :  { %272 = vadd.xlane.f32.xlu1 %v1999_v8 }
 0x1bd   :  { %v243_v9 = vpop.xlane.xlu0 %242 }
 0x1be   :  { %v275_v10 = vmul.f32 0.0078125, %v243_v9 }
 0x1c0   :  { %v2004_v11 = vsub.f32 %v164_v43, %v275_v10 }
 0x1c1   :  { %v247_v12 = vpop.xlane.xlu1 %246  ;;  %v245_v13 = vpop.xlane.xlu0 %244 }
 0x1c2   :  { %v277_v14 = vmul.f32 0.0078125, %v247_v12  ;;  %v276_v15 = vmul.f32 0.0078125, %v245_v13  ;;  %v307_v16 = vmul.f32 %v2004_v11, %v2004_v11 }
 0x1c4   :  { %v2008_v17 = vsub.f32 %v174_v47, %v277_v14  ;;  %v2010_v18 = vsub.f32 %v169_v46, %v276_v15  ;;  %323 = vadd.xlane.f32.xlu0 %v307_v16  ;;  %v590_v14 = vld [vmem:[#allocation5 + $0x90] sm:$0xff]  ;;  %v591_v15 = vld [vmem:[#allocation5 + $0x98] sm:$0xff] }
 0x1c5   :  { %v249_v19 = vpop.xlane.xlu1 %248  ;;  %v251_v20 = vpop.xlane.xlu0 %250  ;;  %v1604_v16 = vpack.c.bf16 %v591_v15, %v590_v14 }
 0x1c6   :  { %v278_v21 = vmul.f32 0.0078125, %v249_v19  ;;  %v279_v22 = vmul.f32 0.0078125, %v251_v20  ;;  %v309_v23 = vmul.f32 %v2008_v17, %v2008_v17  ;;  %v308_v24 = vmul.f32 %v2010_v18, %v2010_v18  ;;  %v592_v19 = vld [vmem:[#allocation5 + $0xa0] sm:$0xff]  ;;  %v593_v20 = vld [vmem:[#allocation5 + $0xa8] sm:$0xff] }
 0x1c7   :  { %1605 = vmatprep.subr.bf16.mxu1 %v1604_v16 }
 0x1c8   :  { %v2016_v25 = vsub.f32 %v179_v50, %v278_v21  ;;  %v2018_v26 = vsub.f32 %v184_v51, %v279_v22  ;;  %327 = vadd.xlane.f32.xlu0 %v309_v23  ;;  %325 = vadd.xlane.f32.xlu1 %v308_v24  ;;  %v1608_v21 = vpack.c.bf16 %v593_v20, %v592_v19  ;;  %v594_v22 = vld [vmem:[#allocation5 + $0xb0] sm:$0xff]  ;;  %v595_v23 = vld [vmem:[#allocation5 + $0xb8] sm:$0xff] }
 0x1c9   :  { %v253_v27 = vpop.xlane.xlu1 %252  ;;  %v255_v28 = vpop.xlane.xlu0 %254  ;;  %1607 = vmatpush3.bf16.msra.mxu1 %v1604_v16  ;;  %v1612_v24 = vpack.c.bf16 %v595_v23, %v594_v22 }
 0x1ca   :  { %v280_v29 = vmul.f32 0.0078125, %v253_v27  ;;  %v281_v30 = vmul.f32 0.0078125, %v255_v28  ;;  %v310_v31 = vmul.f32 %v2016_v25, %v2016_v25  ;;  %v311_v32 = vmul.f32 %v2018_v26, %v2018_v26  ;;  %1609 = vmatprep.subr.bf16.mxu1 %v1608_v21  ;;  %v597_v27 = vld [vmem:[#allocation5 + $0xc8] sm:$0xff] }
 0x1cc   :  { %v2024_v33 = vsub.f32 %v189_v54, %v280_v29  ;;  %v2026_v34 = vsub.f32 %v194_v55, %v281_v30  ;;  %329 = vadd.xlane.f32.xlu1 %v310_v31  ;;  %331 = vadd.xlane.f32.xlu0 %v311_v32  ;;  %v598_v29 = vld [vmem:[#allocation5 + $0xd0] sm:$0xff]  ;;  %v599_v30 = vld [vmem:[#allocation5 + $0xd8] sm:$0xff]  ;;  %v600_v32 = vld [vmem:[#allocation5 + $0xe0] sm:$0xff] }
 0x1cd   :  { %v257_v35 = vpop.xlane.xlu1 %256  ;;  %v259_v36 = vpop.xlane.xlu0 %258  ;;  %1611 = vmatpush3.bf16.msra.mxu1 %v1608_v21  ;;  %v1620_v31 = vpack.c.bf16 %v599_v30, %v598_v29 }
 0x1ce   :  { %v282_v37 = vmul.f32 0.0078125, %v257_v35  ;;  %v283_v38 = vmul.f32 0.0078125, %v259_v36  ;;  %v312_v39 = vmul.f32 %v2024_v33, %v2024_v33  ;;  %v313_v40 = vmul.f32 %v2026_v34, %v2026_v34  ;;  %1613 = vmatprep.subr.bf16.mxu1 %v1612_v24  ;;  %v601_v35 = vld [vmem:[#allocation5 + $0xe8] sm:$0xff] }
 0x1cf   :  { %v1624_v36 = vpack.c.bf16 %v601_v35, %v600_v32 }
 0x1d0   :  { %v2032_v41 = vsub.f32 %v199_v58, %v282_v37  ;;  %v2034_v42 = vsub.f32 %v204_v59, %v283_v38  ;;  %333 = vadd.xlane.f32.xlu1 %v312_v39  ;;  %335 = vadd.xlane.f32.xlu0 %v313_v40  ;;  %v602_v37 = vld [vmem:[#allocation5 + $0xf0] sm:$0xff]  ;;  %v603_v38 = vld [vmem:[#allocation5 + $0xf8] sm:$0xff] }
 0x1d1   :  { %v261_v43 = vpop.xlane.xlu1 %260  ;;  %v263_v44 = vpop.xlane.xlu0 %262  ;;  %1615 = vmatpush3.bf16.msra.mxu1 %v1612_v24  ;;  %v1628_v39 = vpack.c.bf16 %v603_v38, %v602_v37 }
 0x1d2   :  { %v284_v45 = vmul.f32 0.0078125, %v261_v43  ;;  %v285_v46 = vmul.f32 0.0078125, %v263_v44  ;;  %v314_v47 = vmul.f32 %v2032_v41, %v2032_v41  ;;  %v315_v48 = vmul.f32 %v2034_v42, %v2034_v42 }
 0x1d4   :  { %v2041_v49 = vsub.f32 %v1983_v62, %v284_v45  ;;  %v2044_v50 = vsub.f32 %v1985_v63, %v285_v46  ;;  %337 = vadd.xlane.f32.xlu1 %v314_v47  ;;  %339 = vadd.xlane.f32.xlu0 %v315_v48 }
 0x1d5   :  { %v265_v51 = vpop.xlane.xlu1 %264  ;;  %v267_v52 = vpop.xlane.xlu0 %266 }
 0x1d6   :  { %v286_v53 = vmul.f32 0.0078125, %v265_v51  ;;  %v287_v54 = vmul.f32 0.0078125, %v267_v52  ;;  %v316_v55 = vmul.f32 %v2041_v49, %v2041_v49  ;;  %v317_v56 = vmul.f32 %v2044_v50, %v2044_v50 }
 0x1d8   :  { %v2051_v57 = vsub.f32 %v1987_v0, %v286_v53  ;;  %v2054_v58 = vsub.f32 %v1991_v3, %v287_v54  ;;  %341 = vadd.xlane.f32.xlu1 %v316_v55  ;;  %343 = vadd.xlane.f32.xlu0 %v317_v56 }
 0x1d9   :  { %v269_v59 = vpop.xlane.xlu1 %268  ;;  %v271_v60 = vpop.xlane.xlu0 %270 }
 0x1da   :  { %v288_v61 = vmul.f32 0.0078125, %v269_v59  ;;  %v289_v62 = vmul.f32 0.0078125, %v271_v60  ;;  %v318_v63 = vmul.f32 %v2051_v57, %v2051_v57  ;;  %v319_v1 = vmul.f32 %v2054_v58, %v2054_v58 }
 0x1dc   :  { %v2061_v0 = vsub.f32 %v1993_v4, %v288_v61  ;;  %v2064_v3 = vsub.f32 %v1997_v7, %v289_v62  ;;  %345 = vadd.xlane.f32.xlu1 %v318_v63  ;;  %347 = vadd.xlane.f32.xlu0 %v319_v1 }
 0x1dd   :  { %v273_v9 = vpop.xlane.xlu1 %272 }
 0x1de   :  { %v290_v10 = vmul.f32 0.0078125, %v273_v9  ;;  %v320_v12 = vmul.f32 %v2061_v0, %v2061_v0  ;;  %v321_v13 = vmul.f32 %v2064_v3, %v2064_v3 }
 0x1e0   :  { %v2071_v4 = vsub.f32 %v1999_v8, %v290_v10  ;;  %349 = vadd.xlane.f32.xlu1 %v320_v12  ;;  %351 = vadd.xlane.f32.xlu0 %v321_v13  ;;  %v596_v8 = vld [vmem:[#allocation5 + $0xc0] sm:$0xff] }
 0x1e1   :  { %v1616_v28 = vpack.c.bf16 %v597_v27, %v596_v8 }
 0x1e2   :  { %v322_v7 = vmul.f32 %v2071_v4, %v2071_v4 }
 0x1e3   :  { %1617 = vmatprep.subr.bf16.mxu1 %v1616_v28 }
 0x1e4   :  { %353 = vadd.xlane.f32.xlu1 %v322_v7  ;;  %1619 = vmatpush3.bf16.msra.mxu1 %v1616_v28 }
 0x1e5   :  { %1621 = vmatprep.subr.bf16.mxu1 %v1620_v31 }
 0x1e8   :  { %1623 = vmatpush3.bf16.msra.mxu1 %v1620_v31 }
 0x1e9   :  { %1625 = vmatprep.subr.bf16.mxu1 %v1624_v36 }
 0x1ec   :  { %1627 = vmatpush3.bf16.msra.mxu1 %v1624_v36 }
 0x1ed   :  { %1629 = vmatprep.subr.bf16.mxu1 %v1628_v39 }
 0x1f0   :  { %1631 = vmatpush3.bf16.msra.mxu1 %v1628_v39 }
 0x251   :  { %v324_v40 = vpop.xlane.xlu0 %323 }
 0x252   :  { %v355_v43 = vmul.f32 0.007874016, %v324_v40 }
 0x254   :  { %1686 = vrsqrt.f32 %v355_v43  ;;  %vm373_vm0 = vcmp.eq.f32.partialorder %v355_v43, inf  ;;  %v376_v2 = vand.u32 2147483648, %v355_v43  ;;  %vm375_vm2 = vcmp.eq.f32.partialorder %v355_v43, 0.0 }
 0x255   :  { %v326_v44 = vpop.xlane.xlu1 %325  ;;  %v328_v45 = vpop.xlane.xlu0 %327 }
 0x256   :  { %v356_v46 = vmul.f32 0.007874016, %v326_v44  ;;  %v2075_v47 = vmul.f32 0.007874016, %v328_v45 }
 0x258   :  { %1688 = vrsqrt.f32 %v356_v46  ;;  %vm380_vm1 = vcmp.eq.f32.partialorder %v356_v46, inf  ;;  %vm382_vm3 = vcmp.eq.f32.partialorder %v356_v46, 0.0  ;;  %v383_v12 = vand.u32 2147483648, %v356_v46 }
 0x259   :  { %v330_v48 = vpop.xlane.xlu1 %329  ;;  %v332_v51 = vpop.xlane.xlu0 %331  ;;  %1690 = vrsqrt.f32 %v2075_v47  ;;  %vm387_vm4 = vcmp.eq.f32.partialorder %v2075_v47, inf  ;;  %v390_v16 = vand.u32 2147483648, %v2075_v47  ;;  %vm389_vm7 = vcmp.eq.f32.partialorder %v2075_v47, 0.0 }
 0x25a   :  { %v2077_v52 = vmul.f32 0.007874016, %v330_v48  ;;  %v2079_v53 = vmul.f32 0.007874016, %v332_v51 }
 0x25c   :  { %1692 = vrsqrt.f32 %v2077_v52  ;;  %vm394_vm5 = vcmp.eq.f32.partialorder %v2077_v52, inf  ;;  %v397_v21 = vand.u32 2147483648, %v2077_v52  ;;  %vm401_vm6 = vcmp.eq.f32.partialorder %v2079_v53, inf }
 0x25d   :  { %1694 = vrsqrt.f32 %v2079_v53  ;;  %v334_v54 = vpop.xlane.xlu1 %333  ;;  %v336_v55 = vpop.xlane.xlu0 %335  ;;  %v404_v24 = vand.u32 2147483648, %v2079_v53  ;;  %vm396_vm10 = vcmp.eq.f32.partialorder %v2077_v52, 0.0  ;;  %vm403_vm11 = vcmp.eq.f32.partialorder %v2079_v53, 0.0 }
 0x25e   :  { %v1687_v56 = vpop.eup %1686  ;;  %v2084_v59 = vmul.f32 0.007874016, %v334_v54  ;;  %v2086_v60 = vmul.f32 0.007874016, %v336_v55 }
 0x25f   :  { %v372_v61 = vmul.f32 %v1687_v56, %v355_v43 }
 0x260   :  { %1696 = vrsqrt.f32 %v2084_v59  ;;  %vm408_vm8 = vcmp.eq.f32.partialorder %v2084_v59, inf  ;;  %v411_v29 = vand.u32 2147483648, %v2084_v59  ;;  %vm415_vm9 = vcmp.eq.f32.partialorder %v2086_v60, inf }
 0x261   :  { %1698 = vrsqrt.f32 %v2086_v60  ;;  %v338_v62 = vpop.xlane.xlu1 %337  ;;  %v340_v63 = vpop.xlane.xlu0 %339  ;;  %v374_v9 = vsel %vm373_vm0, %v355_v43, %v372_v61  ;;  %v418_v32 = vand.u32 2147483648, %v2086_v60  ;;  %vm410_vm14 = vcmp.eq.f32.partialorder %v2084_v59, 0.0 }
 0x262   :  { %v1689_v1 = vpop.eup %1688  ;;  %v2090_v5 = vmul.f32 0.007874016, %v338_v62  ;;  %v2092_v6 = vmul.f32 0.007874016, %v340_v63  ;;  %v377_v13 = vsel %vm375_vm2, %v376_v2, %v374_v9  ;;  %vm417_vm0 = vcmp.eq.f32.partialorder %v2086_v60, 0.0 }
 0x263   :  { %v379_v10 = vmul.f32 %v1689_v1, %v356_v46  ;;  %v1691_v14 = vpop.eup %1690  ;;  %v483_v27 = vadd.f32 1e-06, %v377_v13 }
 0x264   :  { %1700 = vrsqrt.f32 %v2090_v5  ;;  %v386_v28 = vmul.f32 %v1691_v14, %v2075_v47  ;;  %vm422_vm12 = vcmp.eq.f32.partialorder %v2090_v5, inf  ;;  %v425_v39 = vand.u32 2147483648, %v2090_v5 }
 0x265   :  { %v381_v15 = vsel %vm380_vm1, %v356_v46, %v379_v10  ;;  %1702 = vrsqrt.f32 %v2092_v6  ;;  %v342_v7 = vpop.xlane.xlu1 %341  ;;  %v344_v19 = vpop.xlane.xlu0 %343  ;;  %vm429_vm13 = vcmp.eq.f32.partialorder %v2092_v6, inf  ;;  %v432_v51 = vand.u32 2147483648, %v2092_v6 }
 0x266   :  { %v1693_v20 = vpop.eup %1692  ;;  %v2101_v22 = vmul.f32 0.007874016, %v342_v7  ;;  %v2106_v8 = vmul.f32 0.007874016, %v344_v19  ;;  %v384_v30 = vsel %vm382_vm3, %v383_v12, %v381_v15  ;;  %v388_v46 = vsel %vm387_vm4, %v2075_v47, %v386_v28 }
 0x267   :  { %v1695_v23 = vpop.eup %1694  ;;  %v393_v31 = vmul.f32 %v1693_v20, %v2077_v52  ;;  %v484_v45 = vadd.f32 1e-06, %v384_v30  ;;  %vm424_vm2 = vcmp.eq.f32.partialorder %v2090_v5, 0.0  ;;  %vm431_vm3 = vcmp.eq.f32.partialorder %v2092_v6, 0.0 }
 0x268   :  { %1704 = vrsqrt.f32 %v2101_v22  ;;  %v400_v38 = vmul.f32 %v1695_v23, %v2079_v53  ;;  %vm436_vm15 = vcmp.eq.f32.partialorder %v2101_v22, inf  ;;  %v439_v1 = vand.u32 2147483648, %v2101_v22 }
 0x269   :  { %1706 = vrsqrt.f32 %v2106_v8  ;;  %v346_v35 = vpop.xlane.xlu1 %345  ;;  %v348_v36 = vpop.xlane.xlu0 %347  ;;  %v395_v54 = vsel %vm394_vm5, %v2077_v52, %v393_v31  ;;  %vm443_vm1 = vcmp.eq.f32.partialorder %v2106_v8, inf  ;;  %v446_v12 = vand.u32 2147483648, %v2106_v8 }
 0x26a   :  { %v1697_v37 = vpop.eup %1696  ;;  %v2121_v40 = vmul.f32 0.007874016, %v346_v35  ;;  %v2124_v44 = vmul.f32 0.007874016, %v348_v36  ;;  %1708 = vrcp.f32 %v483_v27  ;;  %v402_v63 = vsel %vm401_vm6, %v2079_v53, %v400_v38 }
 0x26b   :  { %v1699_v43 = vpop.eup %1698  ;;  %v407_v48 = vmul.f32 %v1697_v37, %v2084_v59  ;;  %v391_v7 = vsel %vm389_vm7, %v390_v16, %v388_v46  ;;  %vm438_vm6 = vcmp.eq.f32.partialorder %v2101_v22, 0.0  ;;  %v398_v37 = vsel %vm396_vm10, %v397_v21, %v395_v54  ;;  %v2200_v46 = vld [vmem:[#allocation7 + $0x1] ss:$0 sm:$0xff] }
 0x26c   :  { %1710 = vrsqrt.f32 %v2121_v40  ;;  %v414_v55 = vmul.f32 %v1699_v43, %v2086_v60  ;;  %vm450_vm4 = vcmp.eq.f32.partialorder %v2121_v40, inf  ;;  %v453_v20 = vand.u32 2147483648, %v2121_v40 }
 0x26d   :  { %1712 = vrsqrt.f32 %v2124_v44  ;;  %v350_v56 = vpop.xlane.xlu1 %349  ;;  %v352_v61 = vpop.xlane.xlu0 %351  ;;  %v409_v14 = vsel %vm408_vm8, %v2084_v59, %v407_v48  ;;  %vm457_vm5 = vcmp.eq.f32.partialorder %v2124_v44, inf  ;;  %v460_v47 = vand.u32 2147483648, %v2124_v44 }
 0x26e   :  { %v1701_v62 = vpop.eup %1700  ;;  %v2145_v2 = vmul.f32 0.007874016, %v350_v56  ;;  %v2149_v13 = vmul.f32 0.007874016, %v352_v61  ;;  %1714 = vrcp.f32 %v484_v45  ;;  %v416_v19 = vsel %vm415_vm9, %v2086_v60, %v414_v55 }
 0x26f   :  { %v1703_v9 = vpop.eup %1702  ;;  %v421_v10 = vmul.f32 %v1701_v62, %v2090_v5  ;;  %v485_v36 = vadd.f32 1e-06, %v391_v7  ;;  %v405_v38 = vsel %vm403_vm11, %v404_v24, %v402_v63  ;;  %vm445_vm7 = vcmp.eq.f32.partialorder %v2106_v8, 0.0 }
 0x270   :  { %v428_v15 = vmul.f32 %v1703_v9, %v2092_v6  ;;  %1716 = vrsqrt.f32 %v2145_v2  ;;  %v467_v16 = vand.u32 2147483648, %v2145_v2  ;;  %vm452_vm8 = vcmp.eq.f32.partialorder %v2121_v40, 0.0 }
 0x271   :  { %1718 = vrsqrt.f32 %v2149_v13  ;;  %v354_v23 = vpop.xlane.xlu1 %353  ;;  %v423_v28 = vsel %vm422_vm12, %v2090_v5, %v421_v10  ;;  %vm464_vm9 = vcmp.eq.f32.partialorder %v2145_v2, inf  ;;  %v474_v52 = vand.u32 2147483648, %v2149_v13  ;;  %v2212_v10 = vld [vmem:[#allocation7 + $0x2] ss:$0 sm:$0xff] }
 0x272   :  { %v1705_v27 = vpop.eup %1704  ;;  %v2175_v30 = vmul.f32 0.007874016, %v354_v23  ;;  %v430_v43 = vsel %vm429_vm13, %v2092_v6, %v428_v15  ;;  %vm471_vm10 = vcmp.eq.f32.partialorder %v2149_v13, inf  ;;  %v486_v48 = vadd.f32 1e-06, %v398_v37 }
 0x273   :  { %v1707_v31 = vpop.eup %1706  ;;  %v435_v35 = vmul.f32 %v1705_v27, %v2101_v22  ;;  %vm459_vm11 = vcmp.eq.f32.partialorder %v2124_v44, 0.0  ;;  %v487_v61 = vadd.f32 1e-06, %v405_v38  ;;  %v412_v62 = vsel %vm410_vm14, %v411_v29, %v409_v14 }
 0x274   :  { %v442_v45 = vmul.f32 %v1707_v31, %v2106_v8  ;;  %1720 = vrsqrt.f32 %v2175_v30  ;;  %v1709_v21 = vpop.eup %1708  ;;  %v481_v24 = vand.u32 2147483648, %v2175_v30  ;;  %v488_v15 = vadd.f32 1e-06, %v412_v62 }
 0x275   :  { %v437_v53 = vsel %vm436_vm15, %v2101_v22, %v435_v35  ;;  %1722 = vrcp.f32 %v485_v36  ;;  %v515_v56 = vmul.f32 %v1709_v21, %v2004_v11  ;;  %v419_v7 = vsel %vm417_vm0, %v418_v32, %v416_v19 }
 0x276   :  { %v1711_v54 = vpop.eup %1710  ;;  %v444_v55 = vsel %vm443_vm1, %v2106_v8, %v442_v45  ;;  %1724 = vrcp.f32 %v486_v48  ;;  %vm466_vm12 = vcmp.eq.f32.partialorder %v2145_v2, 0.0  ;;  %vm473_vm13 = vcmp.eq.f32.partialorder %v2149_v13, 0.0 }
 0x277   :  { %v1713_v63 = vpop.eup %1712  ;;  %v449_v9 = vmul.f32 %v1711_v54, %v2121_v40  ;;  %vm478_vm14 = vcmp.eq.f32.partialorder %v2175_v30, inf  ;;  %v535_v59 = vmul.f32 %v2200_v46, %v515_v56  ;;  %1726 = vrcp.f32 %v487_v61 }
 0x278   :  { %v456_v11 = vmul.f32 %v1713_v63, %v2124_v44  ;;  %v489_v29 = vadd.f32 1e-06, %v419_v7  ;;  %v1715_v14 = vpop.eup %1714  ;;  %1728 = vrcp.f32 %v488_v15  ;;  %v426_v60 = vsel %vm424_vm2, %v425_v39, %v423_v28 }
 0x279   :  { %v451_v23 = vsel %vm450_vm4, %v2121_v40, %v449_v9  ;;  %v433_v32 = vsel %vm431_vm3, %v432_v51, %v430_v43  ;;  %vm480_vm15 = vcmp.eq.f32.partialorder %v2175_v30, 0.0  ;;  %v555_v31 = vadd.f32 %v2212_v10, %v535_v59 }
 0x27a   :  { %v1717_v19 = vpop.eup %1716  ;;  %v458_v27 = vsel %vm457_vm5, %v2124_v44, %v456_v11  ;;  %v516_v35 = vmul.f32 %v1715_v14, %v2010_v18  ;;  %1730 = vrcp.f32 %v489_v29  ;;  %v490_v39 = vadd.f32 1e-06, %v426_v60 }
 0x27b   :  { %v1719_v36 = vpop.eup %1718  ;;  %v463_v5 = vmul.f32 %v1717_v19, %v2145_v2  ;;  %v491_v28 = vadd.f32 1e-06, %v433_v32  ;;  %v440_v6 = vsel %vm438_vm6, %v439_v1, %v437_v53  ;;  %v571_v37 = vmax.f32 %v555_v31, 0.0 }
 0x27c   :  { %v470_v51 = vmul.f32 %v1719_v36, %v2149_v13  ;;  %v536_v38 = vmul.f32 %v2200_v46, %v516_v35  ;;  %v492_v43 = vadd.f32 1e-06, %v440_v6  ;;  %1732 = vrcp.f32 %v490_v39 }
 0x27d   :  { %v465_v18 = vsel %vm464_vm9, %v2145_v2, %v463_v5  ;;  %v447_v45 = vsel %vm445_vm7, %v446_v12, %v444_v55  ;;  %v454_v22 = vsel %vm452_vm8, %v453_v20, %v451_v23  ;;  %1488 = vmatprep.mubr.f32.mxu1 %v571_v37  ;;  %1734 = vrcp.f32 %v491_v28 }
 0x27e   :  { %v1721_v1 = vpop.eup %1720  ;;  %v472_v21 = vsel %vm471_vm10, %v2149_v13, %v470_v51  ;;  %v556_v53 = vadd.f32 %v2212_v10, %v536_v38  ;;  %v493_v48 = vadd.f32 1e-06, %v447_v45  ;;  %1736 = vrcp.f32 %v492_v43 }
 0x27f   :  { %v1723_v54 = vpop.eup %1722  ;;  %v477_v56 = vmul.f32 %v1721_v1, %v2175_v30  ;;  %v494_v8 = vadd.f32 1e-06, %v454_v22  ;;  %v461_v40 = vsel %vm459_vm11, %v460_v47, %v458_v27  ;;  %v468_v63 = vsel %vm466_vm12, %v467_v16, %v465_v18 }
 0x280   :  { %v572_v12 = vmax.f32 %v556_v53, 0.0  ;;  %v517_v20 = vmul.f32 %v1723_v54, %v2008_v17  ;;  %1738 = vrcp.f32 %v493_v48  ;;  %v495_v55 = vadd.f32 1e-06, %v461_v40  ;;  %v1725_v61 = vpop.eup %1724 }
 0x281   :  { %v479_v62 = vsel %vm478_vm14, %v2175_v30, %v477_v56  ;;  %1740 = vrcp.f32 %v494_v8  ;;  %v475_v44 = vsel %vm473_vm13, %v474_v52, %v472_v21  ;;  %v1727_v47 = vpop.eup %1726  ;;  %v518_v9 = vmul.f32 %v1725_v61, %v2016_v25 }
 0x282   :  { %1489 = vmatmul.mubr.f32.vlgmr.msra.gmra.mrb[0].mxu1 %v572_v12  ;;  %v537_v17 = vmul.f32 %v2200_v46, %v517_v20  ;;  %1742 = vrcp.f32 %v495_v55  ;;  %v496_v15 = vadd.f32 1e-06, %v468_v63  ;;  %v1729_v7 = vpop.eup %1728  ;;  %v519_v11 = vmul.f32 %v1727_v47, %v2018_v26 }
 0x283   :  { %v497_v59 = vadd.f32 1e-06, %v475_v44  ;;  %v482_v2 = vsel %vm480_vm15, %v481_v24, %v479_v62  ;;  %v538_v52 = vmul.f32 %v2200_v46, %v518_v9  ;;  %v520_v29 = vmul.f32 %v1729_v7, %v2024_v33 }
 0x284   :  { %v1731_v16 = vpop.eup %1730  ;;  %v557_v13 = vadd.f32 %v2212_v10, %v537_v17  ;;  %1744 = vrcp.f32 %v496_v15  ;;  %v539_v25 = vmul.f32 %v2200_v46, %v519_v11  ;;  %v498_v26 = vadd.f32 1e-06, %v482_v2 }
 0x285   :  { %v521_v14 = vmul.f32 %v1731_v16, %v2026_v34  ;;  %1746 = vrcp.f32 %v497_v59  ;;  %v558_v60 = vadd.f32 %v2212_v10, %v538_v52  ;;  %v540_v30 = vmul.f32 %v2200_v46, %v520_v29 }
 0x286   :  { %v573_v23 = vmax.f32 %v557_v13, 0.0  ;;  %v1733_v24 = vpop.eup %1732  ;;  %v559_v32 = vadd.f32 %v2212_v10, %v539_v25  ;;  %1748 = vrcp.f32 %v498_v26  ;;  %v1300_v13 = vld [vmem:[#allocation7 + $0x3] ss:$0 sm:$0xff] }
 0x287   :  { %v541_v19 = vmul.f32 %v2200_v46, %v521_v14  ;;  %v1735_v27 = vpop.eup %1734  ;;  %v574_v33 = vmax.f32 %v558_v60, 0.0  ;;  %v560_v31 = vadd.f32 %v2212_v10, %v540_v30  ;;  %v522_v34 = vmul.f32 %v1733_v24, %v2032_v41 }
 0x288   :  { %1491 = vmatprep.mubr.f32.mxu1 %v573_v23  ;;  %v1737_v35 = vpop.eup %1736  ;;  %v575_v36 = vmax.f32 %v559_v32, 0.0  ;;  %v523_v39 = vmul.f32 %v1735_v27, %v2034_v42 }
 0x289   :  { %v561_v5 = vadd.f32 %v2212_v10, %v541_v19  ;;  %1492 = vmatmul.mubr.f32.gmra.mrb[2].mxu1 %v574_v33  ;;  %v576_v6 = vmax.f32 %v560_v31, 0.0  ;;  %v542_v51 = vmul.f32 %v2200_v46, %v522_v34  ;;  %v524_v37 = vmul.f32 %v1737_v35, %v2041_v49 }
 0x28a   :  { %v1739_v28 = vpop.eup %1738  ;;  %1494 = vmatprep.mubr.f32.mxu1 %v575_v36  ;;  %v543_v18 = vmul.f32 %v2200_v46, %v523_v39 }
 0x28b   :  { %v1741_v38 = vpop.eup %1740  ;;  %v577_v43 = vmax.f32 %v561_v5, 0.0  ;;  %v525_v41 = vmul.f32 %v1739_v28, %v2044_v50  ;;  %v562_v22 = vadd.f32 %v2212_v10, %v542_v51  ;;  %v544_v1 = vmul.f32 %v2200_v46, %v524_v37 }
 0x28c   :  { %v1743_v45 = vpop.eup %1742  ;;  %v526_v42 = vmul.f32 %v1741_v38, %v2051_v57  ;;  %v563_v21 = vadd.f32 %v2212_v10, %v543_v18 }
 0x28d   :  { %v545_v53 = vmul.f32 %v2200_v46, %v525_v41  ;;  %v527_v49 = vmul.f32 %v1743_v45, %v2054_v58  ;;  %1495 = vmatmul.mubr.f32.gmra.mrb[4].mxu1 %v576_v6  ;;  %v578_v54 = vmax.f32 %v562_v22, 0.0  ;;  %v564_v56 = vadd.f32 %v2212_v10, %v544_v1 }
 0x28e   :  { %v1745_v48 = vpop.eup %1744  ;;  %v546_v50 = vmul.f32 %v2200_v46, %v526_v42  ;;  %1497 = vmatprep.mubr.f32.mxu1 %v577_v43  ;;  %v579_v40 = vmax.f32 %v563_v21, 0.0 }
 0x28f   :  { %v1747_v8 = vpop.eup %1746  ;;  %v565_v12 = vadd.f32 %v2212_v10, %v545_v53  ;;  %v547_v57 = vmul.f32 %v2200_v46, %v527_v49  ;;  %v528_v20 = vmul.f32 %v1745_v48, %v2061_v0  ;;  %v580_v58 = vmax.f32 %v564_v56, 0.0 }
 0x290   :  { %v529_v55 = vmul.f32 %v1747_v8, %v2064_v3  ;;  %v1749_v61 = vpop.eup %1748  ;;  %v566_v62 = vadd.f32 %v2212_v10, %v546_v50 }
 0x291   :  { %1498 = vmatmul.mubr.f32.gmra.mrb[6].mxu1 %v578_v54  ;;  %v548_v63 = vmul.f32 %v2200_v46, %v528_v20  ;;  %v530_v44 = vmul.f32 %v1749_v61, %v2071_v4  ;;  %v581_v47 = vmax.f32 %v565_v12, 0.0  ;;  %v567_v17 = vadd.f32 %v2212_v10, %v547_v57 }
 0x292   :  { %1500 = vmatprep.mubr.f32.mxu1 %v579_v40  ;;  %v549_v9 = vmul.f32 %v2200_v46, %v529_v55  ;;  %v582_v15 = vmax.f32 %v566_v62, 0.0 }
 0x293   :  { %v568_v0 = vadd.f32 %v2212_v10, %v548_v63  ;;  %v550_v3 = vmul.f32 %v2200_v46, %v530_v44  ;;  %v583_v7 = vmax.f32 %v567_v17, 0.0 }
 0x294   :  { %v569_v11 = vadd.f32 %v2212_v10, %v549_v9 }
 0x295   :  { %1501 = vmatmul.mubr.f32.gmra.mrb[8].mxu1 %v580_v58  ;;  %v584_v59 = vmax.f32 %v568_v0, 0.0  ;;  %v570_v4 = vadd.f32 %v2212_v10, %v550_v3 }
 0x296   :  { %1503 = vmatprep.mubr.f32.mxu1 %v581_v47  ;;  %v585_v2 = vmax.f32 %v569_v11, 0.0 }
 0x297   :  { %v586_v16 = vmax.f32 %v570_v4, 0.0 }
 0x299   :  { %1504 = vmatmul.mubr.f32.gmra.mrb[10].mxu1 %v582_v15 }
 0x29a   :  { %1506 = vmatprep.mubr.f32.mxu1 %v583_v7 }
 0x29d   :  { %1507 = vmatmul.mubr.f32.gmra.mrb[12].mxu1 %v584_v59 }
 0x29e   :  { %1509 = vmatprep.mubr.f32.mxu1 %v585_v2 }
 0x2a1   :  { %1510 = vmatmul.mubr.f32.gmra.mrb[14].mxu1 %v586_v16 }
 0x355   :  { %v1490_v52 = vpop.f32.mrb[0].mxu1 }
 0x356   :  { %v680_v29 = vadd.f32 %v1490_v52, %v1300_v13  ;;  %v674_v25 = vpop.f32.mrb[1].mxu1 }
 0x357   :  { %v675_v46 = vadd.f32 %v1300_v13, %v674_v25 }
 0x358   :  { %755 = vadd.xlane.f32.xlu0 %v680_v29 }
 0x35c   :  { %753 = vadd.xlane.f32.xlu0 %v675_v46  ;;  %v1493_v14 = vpop.f32.mrb[2].mxu1 }
 0x35d   :  { %v690_v26 = vadd.f32 %v1493_v14, %v1300_v13  ;;  %v684_v23 = vpop.f32.mrb[3].mxu1 }
 0x35e   :  { %v685_v30 = vadd.f32 %v1300_v13, %v684_v23 }
 0x360   :  { %759 = vadd.xlane.f32.xlu0 %v690_v26  ;;  %v1496_v60 = vpop.f32.mrb[4].mxu1 }
 0x361   :  { %v694_v10 = vpop.f32.mrb[5].mxu1  ;;  %v700_v32 = vadd.f32 %v1496_v60, %v1300_v13 }
 0x362   :  { %v695_v33 = vadd.f32 %v1300_v13, %v694_v10 }
 0x364   :  { %757 = vadd.xlane.f32.xlu0 %v685_v30  ;;  %v1499_v24 = vpop.f32.mrb[6].mxu1 }
 0x365   :  { %v704_v19 = vpop.f32.mrb[7].mxu1  ;;  %v2324_v6 = vadd.f32 %v1499_v24, %v1300_v13 }
 0x366   :  { %v705_v36 = vadd.f32 %v1300_v13, %v704_v19 }
 0x368   :  { %763 = vadd.xlane.f32.xlu0 %v700_v32  ;;  %v1502_v27 = vpop.f32.mrb[8].mxu1 }
 0x369   :  { %v720_v31 = vadd.f32 %v1502_v27, %v1300_v13  ;;  %v714_v34 = vpop.f32.mrb[9].mxu1 }
 0x36a   :  { %v715_v5 = vadd.f32 %v1300_v13, %v714_v34  ;;  %v1099_v34 = vld [vmem:[#allocation5 + $0x108] sm:$0xff] }
 0x36b   :  { %771 = vadd.xlane.f32.xlu1 %v720_v31 }
 0x36c   :  { %761 = vadd.xlane.f32.xlu0 %v695_v33  ;;  %v1505_v35 = vpop.f32.mrb[10].mxu1 }
 0x36d   :  { %v724_v39 = vpop.f32.mrb[11].mxu1  ;;  %v2326_v51 = vadd.f32 %v1505_v35, %v1300_v13 }
 0x36e   :  { %v2330_v43 = vadd.f32 %v1300_v13, %v724_v39 }
 0x36f   :  { %769 = vadd.xlane.f32.xlu1 %v715_v5 }
 0x370   :  { %765 = vadd.xlane.f32.xlu0 %v705_v36  ;;  %v1508_v28 = vpop.f32.mrb[12].mxu1 }
 0x371   :  { %v734_v37 = vpop.f32.mrb[13].mxu1  ;;  %v2333_v41 = vadd.f32 %v1508_v28, %v1300_v13 }
 0x372   :  { %v2336_v45 = vadd.f32 %v1300_v13, %v734_v37 }
 0x373   :  { %775 = vadd.xlane.f32.xlu1 %v2326_v51 }
 0x374   :  { %767 = vadd.xlane.f32.xlu0 %v2324_v6  ;;  %v1511_v38 = vpop.f32.mrb[14].mxu1 }
 0x375   :  { %v744_v18 = vpop.f32.mrb[15].mxu1  ;;  %v2342_v1 = vadd.f32 %v1511_v38, %v1300_v13 }
 0x376   :  { %v2339_v22 = vadd.f32 %v1300_v13, %v744_v18 }
 0x377   :  { %773 = vadd.xlane.f32.xlu1 %v2330_v43 }
 0x37b   :  { %779 = vadd.xlane.f32.xlu1 %v2333_v41 }
 0x37f   :  { %777 = vadd.xlane.f32.xlu1 %v2336_v45 }
 0x383   :  { %781 = vadd.xlane.f32.xlu1 %v2339_v22 }
 0x387   :  { %783 = vadd.xlane.f32.xlu1 %v2342_v1 }
 0x3e5   :  { %v756_v42 = vpop.xlane.xlu0 %755 }
 0x3e6   :  { %v786_v21 = vmul.f32 0.0078125, %v756_v42 }
 0x3e8   :  { %v2345_v53 = vsub.f32 %v680_v29, %v786_v21  ;;  %v1103_v21 = vld [vmem:[#allocation5 + $0x128] sm:$0xff] }
 0x3e9   :  { %v754_v49 = vpop.xlane.xlu0 %753 }
 0x3ea   :  { %v785_v48 = vmul.f32 0.0078125, %v754_v49  ;;  %v818_v54 = vmul.f32 %v2345_v53, %v2345_v53 }
 0x3ec   :  { %v2349_v56 = vsub.f32 %v675_v46, %v785_v48  ;;  %835 = vadd.xlane.f32.xlu0 %v818_v54 }
 0x3ed   :  { %v760_v50 = vpop.xlane.xlu0 %759 }
 0x3ee   :  { %v788_v8 = vmul.f32 0.0078125, %v760_v50  ;;  %v817_v40 = vmul.f32 %v2349_v56, %v2349_v56 }
 0x3f0   :  { %v2353_v12 = vsub.f32 %v690_v26, %v788_v8  ;;  %833 = vadd.xlane.f32.xlu0 %v817_v40  ;;  %v1105_v40 = vld [vmem:[#allocation5 + $0x138] sm:$0xff] }
 0x3f1   :  { %v758_v57 = vpop.xlane.xlu0 %757 }
 0x3f2   :  { %v787_v20 = vmul.f32 0.0078125, %v758_v57  ;;  %v820_v55 = vmul.f32 %v2353_v12, %v2353_v12 }
 0x3f4   :  { %v2357_v61 = vsub.f32 %v685_v30, %v787_v20  ;;  %839 = vadd.xlane.f32.xlu0 %v820_v55 }
 0x3f5   :  { %v764_v58 = vpop.xlane.xlu0 %763 }
 0x3f6   :  { %v790_v62 = vmul.f32 0.0078125, %v764_v58  ;;  %v819_v63 = vmul.f32 %v2357_v61, %v2357_v61 }
 0x3f8   :  { %v2361_v44 = vsub.f32 %v700_v32, %v790_v62  ;;  %837 = vadd.xlane.f32.xlu0 %v819_v63  ;;  %v772_v47 = vpop.xlane.xlu1 %771  ;;  %v1107_v63 = vld [vmem:[#allocation5 + $0x148] sm:$0xff] }
 0x3f9   :  { %v762_v17 = vpop.xlane.xlu0 %761  ;;  %v794_v9 = vmul.f32 0.0078125, %v772_v47 }
 0x3fa   :  { %v789_v15 = vmul.f32 0.0078125, %v762_v17  ;;  %v822_v0 = vmul.f32 %v2361_v44, %v2361_v44 }
 0x3fb   :  { %v2365_v3 = vsub.f32 %v720_v31, %v794_v9  ;;  %v1098_v31 = vld [vmem:[#allocation5 + $0x100] sm:$0xff]  ;;  %v1108_v9 = vld [vmem:[#allocation5 + $0x150] sm:$0xff] }
 0x3fc   :  { %v2367_v7 = vsub.f32 %v695_v33, %v789_v15  ;;  %843 = vadd.xlane.f32.xlu0 %v822_v0  ;;  %v770_v11 = vpop.xlane.xlu1 %769  ;;  %v1109_v15 = vld [vmem:[#allocation5 + $0x158] sm:$0xff] }
 0x3fd   :  { %v766_v59 = vpop.xlane.xlu0 %765  ;;  %v793_v4 = vmul.f32 0.0078125, %v770_v11  ;;  %v826_v2 = vmul.f32 %v2365_v3, %v2365_v3  ;;  %v1652_v0 = vpack.c.bf16 %v1109_v15, %v1108_v9  ;;  %v1111_v11 = vld [vmem:[#allocation5 + $0x168] sm:$0xff] }
 0x3fe   :  { %v791_v16 = vmul.f32 0.0078125, %v766_v59  ;;  %v821_v13 = vmul.f32 %v2367_v7, %v2367_v7 }
 0x3ff   :  { %v2373_v52 = vsub.f32 %v715_v5, %v793_v4  ;;  %851 = vadd.xlane.f32.xlu1 %v826_v2  ;;  %v1112_v4 = vld [vmem:[#allocation5 + $0x170] sm:$0xff]  ;;  %v1113_v2 = vld [vmem:[#allocation5 + $0x178] sm:$0xff] }
 0x400   :  { %v2375_v29 = vsub.f32 %v705_v36, %v791_v16  ;;  %841 = vadd.xlane.f32.xlu0 %v821_v13  ;;  %v776_v25 = vpop.xlane.xlu1 %775  ;;  %v1632_v36 = vpack.c.bf16 %v1099_v34, %v1098_v31  ;;  %v1660_v16 = vpack.c.bf16 %v1113_v2, %v1112_v4 }
 0x401   :  { %v768_v46 = vpop.xlane.xlu0 %767  ;;  %v796_v14 = vmul.f32 0.0078125, %v776_v25  ;;  %v825_v26 = vmul.f32 %v2373_v52, %v2373_v52 }
 0x402   :  { %v792_v23 = vmul.f32 0.0078125, %v768_v46  ;;  %v823_v60 = vmul.f32 %v2375_v29, %v2375_v29  ;;  %1633 = vmatprep.subr.bf16.mxu0 %v1632_v36  ;;  %1664 = vmatprep.subr.bf16.mxu1 %v1632_v36 }
 0x403   :  { %v2382_v30 = vsub.f32 %v2326_v51, %v796_v14  ;;  %849 = vadd.xlane.f32.xlu1 %v825_v26  ;;  %1635 = vmatpush3.bf16.msra.mxu0 %v1632_v36  ;;  %v1101_v51 = vld [vmem:[#allocation5 + $0x118] sm:$0xff] }
 0x404   :  { %v2385_v10 = vsub.f32 %v2324_v6, %v792_v23  ;;  %845 = vadd.xlane.f32.xlu0 %v823_v60  ;;  %v774_v24 = vpop.xlane.xlu1 %773  ;;  %v1100_v6 = vld [vmem:[#allocation5 + $0x110] sm:$0xff]  ;;  %1672 = vmatpush3.bf16.msra.mxu1 %v1632_v36 }
 0x405   :  { %v795_v32 = vmul.f32 0.0078125, %v774_v24  ;;  %v828_v19 = vmul.f32 %v2382_v30, %v2382_v30  ;;  %v1636_v38 = vpack.c.bf16 %v1101_v51, %v1100_v6 }
 0x406   :  { %v824_v27 = vmul.f32 %v2385_v10, %v2385_v10 }
 0x407   :  { %v2392_v33 = vsub.f32 %v2330_v43, %v795_v32  ;;  %855 = vadd.xlane.f32.xlu1 %v828_v19  ;;  %1637 = vmatprep.subr.bf16.mxu0 %v1636_v38 }
 0x408   :  { %847 = vadd.xlane.f32.xlu0 %v824_v27  ;;  %v780_v35 = vpop.xlane.xlu1 %779  ;;  %1665 = vmatprep.subr.bf16.mxu1 %v1636_v38 }
 0x409   :  { %v798_v5 = vmul.f32 0.0078125, %v780_v35  ;;  %v827_v39 = vmul.f32 %v2392_v33, %v2392_v33  ;;  %1639 = vmatpush3.bf16.msra.mxu0 %v1636_v38  ;;  %1673 = vmatpush3.bf16.msra.mxu1 %v1636_v38 }
 0x40b   :  { %v2397_v28 = vsub.f32 %v2333_v41, %v798_v5  ;;  %853 = vadd.xlane.f32.xlu1 %v827_v39  ;;  %v1102_v41 = vld [vmem:[#allocation5 + $0x120] sm:$0xff] }
 0x40c   :  { %v778_v37 = vpop.xlane.xlu1 %777  ;;  %v1640_v48 = vpack.c.bf16 %v1103_v21, %v1102_v41 }
 0x40d   :  { %v797_v43 = vmul.f32 0.0078125, %v778_v37  ;;  %v830_v18 = vmul.f32 %v2397_v28, %v2397_v28 }
 0x40e   :  { %1641 = vmatprep.subr.bf16.mxu0 %v1640_v48  ;;  %1666 = vmatprep.subr.bf16.mxu1 %v1640_v48 }
 0x40f   :  { %v2402_v42 = vsub.f32 %v2336_v45, %v797_v43  ;;  %859 = vadd.xlane.f32.xlu1 %v830_v18  ;;  %1643 = vmatpush3.bf16.msra.mxu0 %v1640_v48  ;;  %v1104_v45 = vld [vmem:[#allocation5 + $0x130] sm:$0xff] }
 0x410   :  { %v782_v49 = vpop.xlane.xlu1 %781  ;;  %v1644_v20 = vpack.c.bf16 %v1105_v40, %v1104_v45  ;;  %1674 = vmatpush3.bf16.msra.mxu1 %v1640_v48 }
 0x411   :  { %v799_v54 = vmul.f32 0.0078125, %v782_v49  ;;  %v829_v50 = vmul.f32 %v2402_v42, %v2402_v42 }
 0x412   :  { %1645 = vmatprep.subr.bf16.mxu0 %v1644_v20  ;;  %1667 = vmatprep.subr.bf16.mxu1 %v1644_v20 }
 0x413   :  { %v2407_v8 = vsub.f32 %v2339_v22, %v799_v54  ;;  %857 = vadd.xlane.f32.xlu1 %v829_v50  ;;  %1647 = vmatpush3.bf16.msra.mxu0 %v1644_v20  ;;  %v1106_v22 = vld [vmem:[#allocation5 + $0x140] sm:$0xff] }
 0x414   :  { %v784_v57 = vpop.xlane.xlu1 %783  ;;  %v1648_v47 = vpack.c.bf16 %v1107_v63, %v1106_v22  ;;  %1675 = vmatpush3.bf16.msra.mxu1 %v1644_v20 }
 0x415   :  { %v800_v55 = vmul.f32 0.0078125, %v784_v57  ;;  %v831_v58 = vmul.f32 %v2407_v8, %v2407_v8 }
 0x416   :  { %1649 = vmatprep.subr.bf16.mxu0 %v1648_v47  ;;  %1668 = vmatprep.subr.bf16.mxu1 %v1648_v47 }
 0x417   :  { %v2412_v62 = vsub.f32 %v2342_v1, %v800_v55  ;;  %861 = vadd.xlane.f32.xlu1 %v831_v58  ;;  %1651 = vmatpush3.bf16.msra.mxu0 %v1648_v47  ;;  %v1110_v1 = vld [vmem:[#allocation5 + $0x160] sm:$0xff] }
 0x418   :  { %1676 = vmatpush3.bf16.msra.mxu1 %v1648_v47  ;;  %1653 = vmatprep.subr.bf16.mxu0 %v1652_v0  ;;  %v1656_v59 = vpack.c.bf16 %v1111_v11, %v1110_v1 }
 0x419   :  { %v832_v17 = vmul.f32 %v2412_v62, %v2412_v62  ;;  %1669 = vmatprep.subr.bf16.mxu1 %v1652_v0 }
 0x41b   :  { %863 = vadd.xlane.f32.xlu1 %v832_v17  ;;  %1655 = vmatpush3.bf16.msra.mxu0 %v1652_v0 }
 0x41c   :  { %1677 = vmatpush3.bf16.msra.mxu1 %v1652_v0  ;;  %1657 = vmatprep.subr.bf16.mxu0 %v1656_v59 }
 0x41d   :  { %1670 = vmatprep.subr.bf16.mxu1 %v1656_v59 }
 0x41f   :  { %1659 = vmatpush3.bf16.msra.mxu0 %v1656_v59 }
 0x420   :  { %1678 = vmatpush3.bf16.msra.mxu1 %v1656_v59  ;;  %1661 = vmatprep.subr.bf16.mxu0 %v1660_v16 }
 0x421   :  { %1671 = vmatprep.subr.bf16.mxu1 %v1660_v16 }
 0x423   :  { %1663 = vmatpush3.bf16.msra.mxu0 %v1660_v16 }
 0x424   :  { %1679 = vmatpush3.bf16.msra.mxu1 %v1660_v16 }
 0x479   :  { %v836_v13 = vpop.xlane.xlu0 %835 }
 0x47a   :  { %v866_v25 = vmul.f32 0.007874016, %v836_v13 }
 0x47c   :  { %1750 = vrsqrt.f32 %v866_v25  ;;  %vm890_vm0 = vcmp.eq.f32.partialorder %v866_v25, inf  ;;  %v893_v27 = vand.u32 2147483648, %v866_v25  ;;  %vm892_vm1 = vcmp.eq.f32.partialorder %v866_v25, 0.0 }
 0x47d   :  { %v834_v46 = vpop.xlane.xlu0 %833 }
 0x47e   :  { %v865_v14 = vmul.f32 0.007874016, %v834_v46 }
 0x480   :  { %1752 = vrsqrt.f32 %v865_v14  ;;  %vm883_vm2 = vcmp.eq.f32.partialorder %v865_v14, inf  ;;  %v886_v51 = vand.u32 2147483648, %v865_v14  ;;  %vm885_vm3 = vcmp.eq.f32.partialorder %v865_v14, 0.0 }
 0x481   :  { %v840_v26 = vpop.xlane.xlu0 %839 }
 0x482   :  { %v868_v23 = vmul.f32 0.007874016, %v840_v26 }
 0x484   :  { %1754 = vrsqrt.f32 %v868_v23  ;;  %vm904_vm4 = vcmp.eq.f32.partialorder %v868_v23, inf  ;;  %v907_v20 = vand.u32 2147483648, %v868_v23  ;;  %vm906_vm5 = vcmp.eq.f32.partialorder %v868_v23, 0.0 }
 0x485   :  { %v838_v60 = vpop.xlane.xlu0 %837 }
 0x486   :  { %v1751_v24 = vpop.eup %1750  ;;  %v867_v32 = vmul.f32 0.007874016, %v838_v60  ;;  %v2448_v60 = vld [vmem:[#allocation7 + $0x4] ss:$0 sm:$0xff] }
 0x487   :  { %v889_v19 = vmul.f32 %v1751_v24, %v866_v25 }
 0x488   :  { %1756 = vrsqrt.f32 %v867_v32  ;;  %vm897_vm6 = vcmp.eq.f32.partialorder %v867_v32, inf  ;;  %v900_v63 = vand.u32 2147483648, %v867_v32  ;;  %vm899_vm7 = vcmp.eq.f32.partialorder %v867_v32, 0.0 }
 0x489   :  { %v891_v31 = vsel %vm890_vm0, %v866_v25, %v889_v19  ;;  %v844_v34 = vpop.xlane.xlu0 %843 }
 0x48a   :  { %v1753_v35 = vpop.eup %1752  ;;  %v894_v36 = vsel %vm892_vm1, %v893_v27, %v891_v31  ;;  %v2416_v5 = vmul.f32 0.007874016, %v844_v34 }
 0x48b   :  { %v994_v39 = vadd.f32 1e-06, %v894_v36  ;;  %v882_v6 = vmul.f32 %v1753_v35, %v865_v14 }
 0x48c   :  { %1758 = vrsqrt.f32 %v2416_v5  ;;  %v852_v38 = vpop.xlane.xlu1 %851  ;;  %vm918_vm8 = vcmp.eq.f32.partialorder %v2416_v5, inf  ;;  %vm920_vm9 = vcmp.eq.f32.partialorder %v2416_v5, 0.0  ;;  %v921_v13 = vand.u32 2147483648, %v2416_v5 }
 0x48d   :  { %1760 = vrcp.f32 %v994_v39  ;;  %v884_v37 = vsel %vm883_vm2, %v865_v14, %v882_v6  ;;  %v842_v43 = vpop.xlane.xlu0 %841  ;;  %v2419_v41 = vmul.f32 0.007874016, %v852_v38  ;;  %v2464_v6 = vld [vmem:[#allocation7 + $0x5] ss:$0 sm:$0xff] }
 0x48e   :  { %v1755_v18 = vpop.eup %1754  ;;  %v2421_v21 = vmul.f32 0.007874016, %v842_v43  ;;  %v887_v49 = vsel %vm885_vm3, %v886_v51, %v884_v37 }
 0x48f   :  { %v903_v48 = vmul.f32 %v1755_v18, %v868_v23  ;;  %v993_v54 = vadd.f32 1e-06, %v887_v49  ;;  %1762 = vrsqrt.f32 %v2419_v41  ;;  %vm946_vm10 = vcmp.eq.f32.partialorder %v2419_v41, inf }
 0x490   :  { %v850_v45 = vpop.xlane.xlu1 %849  ;;  %1764 = vrsqrt.f32 %v2421_v21  ;;  %vm948_vm11 = vcmp.eq.f32.partialorder %v2419_v41, 0.0  ;;  %v949_v25 = vand.u32 2147483648, %v2419_v41  ;;  %vm911_vm12 = vcmp.eq.f32.partialorder %v2421_v21, inf }
 0x491   :  { %v905_v50 = vsel %vm904_vm4, %v868_v23, %v903_v48  ;;  %v846_v40 = vpop.xlane.xlu0 %845  ;;  %v2425_v55 = vmul.f32 0.007874016, %v850_v45  ;;  %1766 = vrcp.f32 %v993_v54  ;;  %vm913_vm13 = vcmp.eq.f32.partialorder %v2421_v21, 0.0 }
 0x492   :  { %v1757_v57 = vpop.eup %1756  ;;  %v2427_v58 = vmul.f32 0.007874016, %v846_v40  ;;  %v908_v47 = vsel %vm906_vm5, %v907_v20, %v905_v50  ;;  %v914_v27 = vand.u32 2147483648, %v2421_v21 }
 0x493   :  { %v896_v22 = vmul.f32 %v1757_v57, %v867_v32  ;;  %1768 = vrsqrt.f32 %v2425_v55  ;;  %v996_v16 = vadd.f32 1e-06, %v908_v47  ;;  %vm939_vm14 = vcmp.eq.f32.partialorder %v2425_v55, inf }
 0x494   :  { %v856_v9 = vpop.xlane.xlu1 %855  ;;  %1770 = vrsqrt.f32 %v2427_v58  ;;  %vm941_vm15 = vcmp.eq.f32.partialorder %v2425_v55, 0.0  ;;  %v942_v34 = vand.u32 2147483648, %v2425_v55  ;;  %vm925_vm0 = vcmp.eq.f32.partialorder %v2427_v58, inf }
 0x495   :  { %v898_v17 = vsel %vm897_vm6, %v867_v32, %v896_v22  ;;  %v848_v15 = vpop.xlane.xlu0 %847  ;;  %v2431_v1 = vmul.f32 0.007874016, %v856_v9  ;;  %v928_v18 = vand.u32 2147483648, %v2427_v58  ;;  %vm927_vm3 = vcmp.eq.f32.partialorder %v2427_v58, 0.0 }
 0x496   :  { %v1759_v0 = vpop.eup %1758  ;;  %v2433_v11 = vmul.f32 0.007874016, %v848_v15  ;;  %v901_v59 = vsel %vm899_vm7, %v900_v63, %v898_v17 }
 0x497   :  { %v1761_v4 = vpop.eup %1760  ;;  %v995_v2 = vadd.f32 1e-06, %v901_v59  ;;  %1772 = vrsqrt.f32 %v2431_v1  ;;  %v917_v46 = vmul.f32 %v1759_v0, %v2416_v5  ;;  %vm960_vm1 = vcmp.eq.f32.partialorder %v2431_v1, inf }
 0x498   :  { %v854_v14 = vpop.xlane.xlu1 %853  ;;  %1774 = vrsqrt.f32 %v2433_v11  ;;  %v1026_v24 = vmul.f32 %v1761_v4, %v2345_v53  ;;  %vm932_vm2 = vcmp.eq.f32.partialorder %v2433_v11, inf  ;;  %vm934_vm4 = vcmp.eq.f32.partialorder %v2433_v11, 0.0 }
 0x499   :  { %v1763_v26 = vpop.eup %1762  ;;  %v2446_v23 = vmul.f32 0.007874016, %v854_v14  ;;  %1776 = vrcp.f32 %v995_v2  ;;  %v919_v36 = vsel %vm918_vm8, %v2416_v5, %v917_v46  ;;  %v935_v17 = vand.u32 2147483648, %v2433_v11 }
 0x49a   :  { %v1765_v32 = vpop.eup %1764  ;;  %v945_v19 = vmul.f32 %v1763_v26, %v2419_v41  ;;  %1778 = vrcp.f32 %v996_v16  ;;  %v1046_v37 = vmul.f32 %v2448_v60, %v1026_v24  ;;  %v922_v40 = vsel %vm920_vm9, %v921_v13, %v919_v36 }
 0x49b   :  { %v1767_v31 = vpop.eup %1766  ;;  %v910_v35 = vmul.f32 %v1765_v32, %v2421_v21  ;;  %1780 = vrsqrt.f32 %v2446_v23  ;;  %v998_v2 = vadd.f32 1e-06, %v922_v40  ;;  %vm962_vm5 = vcmp.eq.f32.partialorder %v2431_v1, 0.0 }
 0x49c   :  { %v947_v53 = vsel %vm946_vm10, %v2419_v41, %v945_v19  ;;  %v860_v39 = vpop.xlane.xlu1 %859  ;;  %v1025_v51 = vmul.f32 %v1767_v31, %v2349_v56  ;;  %v1066_v41 = vadd.f32 %v2464_v6, %v1046_v37  ;;  %vm953_vm6 = vcmp.eq.f32.partialorder %v2446_v23, inf }
 0x49d   :  { %v1769_v38 = vpop.eup %1768  ;;  %v950_v43 = vsel %vm948_vm11, %v949_v25, %v947_v53  ;;  %v2472_v49 = vmul.f32 0.007874016, %v860_v39  ;;  %v912_v56 = vsel %vm911_vm12, %v2421_v21, %v910_v35  ;;  %vm955_vm7 = vcmp.eq.f32.partialorder %v2446_v23, 0.0 }
 0x49e   :  { %v1771_v48 = vpop.eup %1770  ;;  %v1002_v54 = vadd.f32 1e-06, %v950_v43  ;;  %v938_v50 = vmul.f32 %v1769_v38, %v2425_v55  ;;  %v1045_v45 = vmul.f32 %v2448_v60, %v1025_v51  ;;  %v915_v5 = vsel %vm913_vm13, %v914_v27, %v912_v56 }
 0x49f   :  { %1782 = vrsqrt.f32 %v2472_v49  ;;  %v924_v20 = vmul.f32 %v1771_v48, %v2427_v58  ;;  %v997_v59 = vadd.f32 1e-06, %v915_v5  ;;  %v1082_v46 = vmax.f32 %v1066_v41, 0.0 }
 0x4a0   :  { %v940_v57 = vsel %vm939_vm14, %v2425_v55, %v938_v50  ;;  %v858_v22 = vpop.xlane.xlu1 %857  ;;  %v1065_v63 = vadd.f32 %v2464_v6, %v1045_v45  ;;  %1784 = vrcp.f32 %v1002_v54  ;;  %v956_v36 = vand.u32 2147483648, %v2446_v23 }
 0x4a1   :  { %v1773_v47 = vpop.eup %1772  ;;  %v2493_v9 = vmul.f32 0.007874016, %v858_v22  ;;  %v943_v4 = vsel %vm941_vm15, %v942_v34, %v940_v57  ;;  %v926_v21 = vsel %vm925_vm0, %v2427_v58, %v924_v20  ;;  %v963_v40 = vand.u32 2147483648, %v2431_v1 }
 0x4a2   :  { %v1775_v15 = vpop.eup %1774  ;;  %v1081_v0 = vmax.f32 %v1065_v63, 0.0  ;;  %v959_v13 = vmul.f32 %v1773_v47, %v2431_v1  ;;  %v1001_v31 = vadd.f32 1e-06, %v943_v4  ;;  %v929_v43 = vsel %vm927_vm3, %v928_v18, %v926_v21 }
 0x4a3   :  { %v1777_v16 = vpop.eup %1776  ;;  %v931_v25 = vmul.f32 %v1775_v15, %v2433_v11  ;;  %1786 = vrsqrt.f32 %v2493_v9  ;;  %v999_v45 = vadd.f32 1e-06, %v929_v43  ;;  %vm974_vm8 = vcmp.eq.f32.partialorder %v2472_v49, inf }
 0x4a4   :  { %v1779_v14 = vpop.eup %1778  ;;  %v862_v55 = vpop.xlane.xlu1 %861  ;;  %1544 = vmatprep.mubr.f32.mxu0 %v1081_v0  ;;  %v1027_v26 = vmul.f32 %v1777_v16, %v2357_v61  ;;  %1788 = vrcp.f32 %v997_v59  ;;  %v961_v61 = vsel %vm960_vm1, %v2431_v1, %v959_v13  ;;  %v977_v57 = vand.u32 2147483648, %v2472_v49 }
 0x4a5   :  { %v1781_v24 = vpop.eup %1780  ;;  %v933_v32 = vsel %vm932_vm2, %v2433_v11, %v931_v25  ;;  %v2511_v19 = vmul.f32 0.007874016, %v862_v55  ;;  %1545 = vmatmul.mubr.f32.vlgmr.msra.gmra.mrb[16].mxu0 %v1082_v46  ;;  %v1028_v27 = vmul.f32 %v1779_v14, %v2353_v12  ;;  %1790 = vrcp.f32 %v998_v2 }
 0x4a6   :  { %v952_v34 = vmul.f32 %v1781_v24, %v2446_v23  ;;  %v936_v35 = vsel %vm934_vm4, %v935_v17, %v933_v32  ;;  %v1047_v53 = vmul.f32 %v2448_v60, %v1027_v26  ;;  %vm976_vm9 = vcmp.eq.f32.partialorder %v2472_v49, 0.0 }
 0x4a7   :  { %1792 = vrsqrt.f32 %v2511_v19  ;;  %v1048_v51 = vmul.f32 %v2448_v60, %v1028_v27  ;;  %v1000_v48 = vadd.f32 1e-06, %v936_v35  ;;  %v964_v63 = vsel %vm962_vm5, %v963_v40, %v961_v61 }
 0x4a8   :  { %v954_v12 = vsel %vm953_vm6, %v2446_v23, %v952_v34  ;;  %v864_v39 = vpop.xlane.xlu1 %863  ;;  %v1067_v11 = vadd.f32 %v2464_v6, %v1047_v53  ;;  %1794 = vrcp.f32 %v1001_v31  ;;  %v1004_v0 = vadd.f32 1e-06, %v964_v63 }
 0x4a9   :  { %v1783_v37 = vpop.eup %1782  ;;  %v2529_v38 = vmul.f32 0.007874016, %v864_v39  ;;  %v957_v54 = vsel %vm955_vm7, %v956_v36, %v954_v12  ;;  %v1068_v23 = vadd.f32 %v2464_v6, %v1048_v51  ;;  %vm967_vm10 = vcmp.eq.f32.partialorder %v2493_v9, inf }
 0x4aa   :  { %v973_v50 = vmul.f32 %v1783_v37, %v2472_v49  ;;  %v1083_v56 = vmax.f32 %v1067_v11, 0.0  ;;  %v1785_v41 = vpop.eup %1784  ;;  %v1003_v22 = vadd.f32 1e-06, %v957_v54  ;;  %vm969_vm11 = vcmp.eq.f32.partialorder %v2493_v9, 0.0 }
 0x4ab   :  { %1796 = vrsqrt.f32 %v2529_v38  ;;  %v1084_v18 = vmax.f32 %v1068_v23, 0.0  ;;  %v1034_v15 = vmul.f32 %v1785_v41, %v2365_v3  ;;  %vm981_vm12 = vcmp.eq.f32.partialorder %v2511_v19, inf }
 0x4ac   :  { %v975_v58 = vsel %vm974_vm8, %v2472_v49, %v973_v50  ;;  %1547 = vmatprep.mubr.f32.mxu0 %v1083_v56  ;;  %1798 = vrcp.f32 %v999_v45  ;;  %v970_v49 = vand.u32 2147483648, %v2493_v9  ;;  %v984_v55 = vand.u32 2147483648, %v2511_v19 }
 0x4ad   :  { %v1787_v20 = vpop.eup %1786  ;;  %1800 = vrcp.f32 %v1000_v48  ;;  %v978_v47 = vsel %vm976_vm9, %v977_v57, %v975_v58  ;;  %1548 = vmatmul.mubr.f32.gmra.mrb[18].mxu0 %v1084_v18  ;;  %vm983_vm13 = vcmp.eq.f32.partialorder %v2511_v19, 0.0  ;;  %vm988_vm14 = vcmp.eq.f32.partialorder %v2529_v38, inf }
 0x4ae   :  { %v1789_v17 = vpop.eup %1788  ;;  %v966_v5 = vmul.f32 %v1787_v20, %v2493_v9  ;;  %v1006_v59 = vadd.f32 1e-06, %v978_v47  ;;  %1802 = vrcp.f32 %v1003_v22  ;;  %v991_v39 = vand.u32 2147483648, %v2529_v38 }
 0x4af   :  { %v1029_v4 = vmul.f32 %v1789_v17, %v2367_v7  ;;  %v1791_v2 = vpop.eup %1790  ;;  %1804 = vrcp.f32 %v1004_v0  ;;  %v1054_v7 = vmul.f32 %v2448_v60, %v1034_v15  ;;  %vm990_vm15 = vcmp.eq.f32.partialorder %v2529_v38, 0.0 }
 0x4b0   :  { %v968_v1 = vsel %vm967_vm10, %v2493_v9, %v966_v5  ;;  %v1030_v3 = vmul.f32 %v1791_v2, %v2361_v44  ;;  %1806 = vrcp.f32 %v1006_v59 }
 0x4b1   :  { %v1793_v16 = vpop.eup %1792  ;;  %v1049_v13 = vmul.f32 %v2448_v60, %v1029_v4  ;;  %v971_v25 = vsel %vm969_vm11, %v970_v49, %v968_v1 }
 0x4b2   :  { %v1795_v46 = vpop.eup %1794  ;;  %v980_v14 = vmul.f32 %v1793_v16, %v2511_v19  ;;  %v1005_v21 = vadd.f32 1e-06, %v971_v25  ;;  %v1050_v24 = vmul.f32 %v2448_v60, %v1030_v3 }
 0x4b3   :  { %v1069_v9 = vadd.f32 %v2464_v6, %v1049_v13  ;;  %v1033_v26 = vmul.f32 %v1795_v46, %v2373_v52  ;;  %v1074_v52 = vadd.f32 %v2464_v6, %v1054_v7 }
 0x4b4   :  { %v982_v44 = vsel %vm981_vm12, %v2511_v19, %v980_v14  ;;  %1808 = vrcp.f32 %v1005_v21  ;;  %v1070_v34 = vadd.f32 %v2464_v6, %v1050_v24 }
 0x4b5   :  { %v1797_v32 = vpop.eup %1796  ;;  %v1085_v27 = vmax.f32 %v1069_v9, 0.0  ;;  %v1053_v31 = vmul.f32 %v2448_v60, %v1033_v26  ;;  %v985_v35 = vsel %vm983_vm13, %v984_v55, %v982_v44  ;;  %v1090_v45 = vmax.f32 %v1074_v52, 0.0 }
 0x4b6   :  { %v1799_v53 = vpop.eup %1798  ;;  %v987_v61 = vmul.f32 %v1797_v32, %v2529_v38  ;;  %v1007_v36 = vadd.f32 1e-06, %v985_v35  ;;  %v1086_v11 = vmax.f32 %v1070_v34, 0.0 }
 0x4b7   :  { %v1801_v12 = vpop.eup %1800  ;;  %1550 = vmatprep.mubr.f32.mxu0 %v1085_v27  ;;  %v1073_v19 = vadd.f32 %v2464_v6, %v1053_v31  ;;  %v1031_v51 = vmul.f32 %v1799_v53, %v2375_v29 }
 0x4b8   :  { %v989_v37 = vsel %vm988_vm14, %v2529_v38, %v987_v61  ;;  %v1032_v43 = vmul.f32 %v1801_v12, %v2385_v10  ;;  %1810 = vrcp.f32 %v1007_v36  ;;  %v1803_v48 = vpop.eup %1802  ;;  %1551 = vmatmul.mubr.f32.gmra.mrb[20].mxu0 %v1086_v11 }
 0x4b9   :  { %v992_v54 = vsel %vm990_vm15, %v991_v39, %v989_v37  ;;  %v1089_v50 = vmax.f32 %v1073_v19, 0.0  ;;  %v1051_v56 = vmul.f32 %v2448_v60, %v1031_v51  ;;  %v1805_v23 = vpop.eup %1804  ;;  %v1035_v40 = vmul.f32 %v1803_v48, %v2392_v33 }
 0x4ba   :  { %v1052_v41 = vmul.f32 %v2448_v60, %v1032_v43  ;;  %v1008_v29 = vadd.f32 1e-06, %v992_v54  ;;  %v1807_v57 = vpop.eup %1806  ;;  %v1036_v10 = vmul.f32 %v1805_v23, %v2382_v30 }
 0x4bb   :  { %1556 = vmatprep.mubr.f32.mxu1 %v1089_v50  ;;  %v1071_v38 = vadd.f32 %v2464_v6, %v1051_v56  ;;  %v1055_v18 = vmul.f32 %v2448_v60, %v1035_v40  ;;  %v1038_v20 = vmul.f32 %v1807_v57, %v2397_v28 }
 0x4bc   :  { %1557 = vmatmul.mubr.f32.vlgmr.msra.gmra.mrb[16].mxu1 %v1090_v45  ;;  %v1072_v58 = vadd.f32 %v2464_v6, %v1052_v41  ;;  %1812 = vrcp.f32 %v1008_v29  ;;  %v1056_v63 = vmul.f32 %v2448_v60, %v1036_v10 }
 0x4bd   :  { %v1087_v22 = vmax.f32 %v1071_v38, 0.0  ;;  %v1075_v17 = vadd.f32 %v2464_v6, %v1055_v18  ;;  %v1058_v5 = vmul.f32 %v2448_v60, %v1038_v20 }
 0x4be   :  { %v1809_v47 = vpop.eup %1808  ;;  %v1088_v33 = vmax.f32 %v1072_v58, 0.0  ;;  %v1076_v30 = vadd.f32 %v2464_v6, %v1056_v63 }
 0x4bf   :  { %1553 = vmatprep.mubr.f32.mxu0 %v1087_v22  ;;  %v1037_v15 = vmul.f32 %v1809_v47, %v2402_v42  ;;  %v1091_v0 = vmax.f32 %v1075_v17, 0.0  ;;  %v1078_v4 = vadd.f32 %v2464_v6, %v1058_v5 }
 0x4c0   :  { %1554 = vmatmul.mubr.f32.gmra.mrb[22].mxu0 %v1088_v33  ;;  %v1092_v59 = vmax.f32 %v1076_v30, 0.0 }
 0x4c1   :  { %v1057_v28 = vmul.f32 %v2448_v60, %v1037_v15  ;;  %1559 = vmatprep.mubr.f32.mxu1 %v1091_v0  ;;  %v1094_v25 = vmax.f32 %v1078_v4, 0.0 }
 0x4c2   :  { %v1811_v49 = vpop.eup %1810  ;;  %1560 = vmatmul.mubr.f32.gmra.mrb[18].mxu1 %v1092_v59 }
 0x4c3   :  { %v1077_v2 = vadd.f32 %v2464_v6, %v1057_v28  ;;  %v1039_v1 = vmul.f32 %v1811_v49, %v2407_v8  ;;  %v1303_v8 = vld [vmem:[#allocation7 + $0x6] ss:$0 sm:$0xff] }
 0x4c5   :  { %v1093_v16 = vmax.f32 %v1077_v2, 0.0  ;;  %v1059_v13 = vmul.f32 %v2448_v60, %v1039_v1 }
 0x4c6   :  { %v1813_v3 = vpop.eup %1812 }
 0x4c7   :  { %1562 = vmatprep.mubr.f32.mxu1 %v1093_v16  ;;  %v1079_v42 = vadd.f32 %v2464_v6, %v1059_v13  ;;  %v1040_v46 = vmul.f32 %v1813_v3, %v2412_v62 }
 0x4c8   :  { %1563 = vmatmul.mubr.f32.gmra.mrb[20].mxu1 %v1094_v25 }
 0x4c9   :  { %v1095_v14 = vmax.f32 %v1079_v42, 0.0  ;;  %v1060_v7 = vmul.f32 %v2448_v60, %v1040_v46 }
 0x4cb   :  { %1565 = vmatprep.mubr.f32.mxu1 %v1095_v14  ;;  %v1080_v21 = vadd.f32 %v2464_v6, %v1060_v7 }
 0x4cd   :  { %v1096_v55 = vmax.f32 %v1080_v21, 0.0 }
 0x4cf   :  { %1566 = vmatmul.mubr.f32.gmra.mrb[22].mxu1 %v1096_v55 }
 0x578   :  { %v1546_v9 = vpop.f32.mrb[16].mxu0 }
 0x579   :  { %v1190_v26 = vadd.f32 %v1546_v9, %v1303_v8  ;;  %v1184_v24 = vpop.f32.mrb[17].mxu0 }
 0x57a   :  { %v1185_v44 = vadd.f32 %v1303_v8, %v1184_v24 }
 0x57b   :  { %1264 = vst [vmem:[#allocation8 + $0x8] sm:$0xff] %v1190_v26 }
 0x57c   :  { %1263 = vst [vmem:[#allocation8] sm:$0xff] %v1185_v44 }
 0x580   :  { %v1549_v32 = vpop.f32.mrb[18].mxu0 }
 0x581   :  { %v1200_v27 = vadd.f32 %v1549_v32, %v1303_v8  ;;  %v1194_v31 = vpop.f32.mrb[19].mxu0 }
 0x582   :  { %v1195_v62 = vadd.f32 %v1303_v8, %v1194_v31 }
 0x583   :  { %1266 = vst [vmem:[#allocation8 + $0x18] sm:$0xff] %v1200_v27 }
 0x584   :  { %1265 = vst [vmem:[#allocation8 + $0x10] sm:$0xff] %v1195_v62 }
 0x58b   :  { %v1552_v34 = vpop.f32.mrb[20].mxu0 }
 0x58c   :  { %v1210_v60 = vadd.f32 %v1552_v34, %v1303_v8  ;;  %v1204_v35 = vpop.f32.mrb[21].mxu0 }
 0x58d   :  { %v1205_v53 = vadd.f32 %v1303_v8, %v1204_v35 }
 0x58e   :  { %1268 = vst [vmem:[#allocation8 + $0x28] sm:$0xff] %v1210_v60 }
 0x58f   :  { %v1558_v6 = vpop.f32.mrb[16].mxu1  ;;  %1267 = vst [vmem:[#allocation8 + $0x20] sm:$0xff] %v1205_v53 }
 0x590   :  { %v1230_v61 = vadd.f32 %v1558_v6, %v1303_v8  ;;  %v1224_v52 = vpop.f32.mrb[17].mxu1 }
 0x591   :  { %v1225_v36 = vadd.f32 %v1303_v8, %v1224_v52 }
 0x592   :  { %1272 = vst [vmem:[#allocation8 + $0x48] sm:$0xff] %v1230_v61 }
 0x593   :  { %1271 = vst [vmem:[#allocation8 + $0x40] sm:$0xff] %v1225_v36  ;;  %v1555_v12 = vpop.f32.mrb[22].mxu0 }
 0x594   :  { %v1220_v39 = vadd.f32 %v1555_v12, %v1303_v8  ;;  %v1214_v19 = vpop.f32.mrb[23].mxu0 }
 0x595   :  { %v1215_v11 = vadd.f32 %v1303_v8, %v1214_v19  ;;  %v1561_v51 = vpop.f32.mrb[18].mxu1 }
 0x596   :  { %1270 = vst [vmem:[#allocation8 + $0x38] sm:$0xff] %v1220_v39  ;;  %v1240_v37 = vadd.f32 %v1561_v51, %v1303_v8  ;;  %v1234_v43 = vpop.f32.mrb[19].mxu1 }
 0x597   :  { %1269 = vst [vmem:[#allocation8 + $0x30] sm:$0xff] %v1215_v11  ;;  %v1235_v48 = vadd.f32 %v1303_v8, %v1234_v43 }
 0x598   :  { %1274 = vst [vmem:[#allocation8 + $0x58] sm:$0xff] %v1240_v37 }
 0x599   :  { %1273 = vst [vmem:[#allocation8 + $0x50] sm:$0xff] %v1235_v48 }
 0x59b   :  { %v1564_v54 = vpop.f32.mrb[20].mxu1 }
 0x59c   :  { %v1250_v50 = vadd.f32 %v1564_v54, %v1303_v8  ;;  %v1244_v56 = vpop.f32.mrb[21].mxu1 }
 0x59d   :  { %v1245_v23 = vadd.f32 %v1303_v8, %v1244_v56 }
 0x59e   :  { %1276 = vst [vmem:[#allocation8 + $0x68] sm:$0xff] %v1250_v50 }
 0x59f   :  { %1275 = vst [vmem:[#allocation8 + $0x60] sm:$0xff] %v1245_v23 }
 0x5a2   :  { %v1567_v45 = vpop.f32.mrb[22].mxu1 }
 0x5a3   :  { %v1260_v41 = vadd.f32 %v1567_v45, %v1303_v8  ;;  %v1254_v40 = vpop.f32.mrb[23].mxu1 }
 0x5a4   :  { %v1255_v29 = vadd.f32 %v1303_v8, %v1254_v40 }
 0x5a5   :  { %1278 = vst [vmem:[#allocation8 + $0x78] sm:$0xff] %v1260_v41 }
 0x5a6   :  { %1277 = vst [vmem:[#allocation8 + $0x70] sm:$0xff] %v1255_v29 }
 0x5a7   :  { %1891 = shalt.err (!%p1888_p0)
}
 0x5a8   :  { %s1892_s27 = scalar_lea.hbm %s2614_s3, 2048 }
 0x5a9   :  { %p1893_p1 = scmp.ne.s32.totalorder %s2614_s3, %s1892_s27  ;;  %p1896_p2 = scmp.lt.u32.totalorder %s1892_s27, %s2614_s3 }
 0x5ab   :  { %p1898_p3 = pnand %p1896_p2, %p1893_p1 }
 0x5ad   :  { %1901 = shalt.err (!%p1898_p3)
}
 0x5ae   :  { %1290 = dma.vmem_to_hbm [thread:$0]  %s1285_s21, 2048, %s2614_s3, [#allocation4], %s1910_s24, %s1910_s24, %s1911_s25  }
 0x5af   :  { %1906 = dma.done.wait [#allocation4], 2048  }
 0x5b0   :  { %1907 = vsyncadd [#allocation4], 4294965248 }
 0x5b1   :  { %1294 = vsyncpa [#allocation3], 1 }
 0x5b2   :  { %1295 = vsyncpa [#allocation6], 1 }
 0x5b3   :  { %1296 = vsyncpa [#allocation4], 1 }

</bundles_post_ra>
